<compile_context>
chip_gen: v7x
topology: tpu7x:2x2x1
jax: 0.10.0
libtpu: 0.0.40
codegen_flags: <defaults>
</compile_context>

<pallas_src>
import functools
import math

import jax
import jax.numpy as jnp
from jax import lax
from jax.experimental import pallas as pl
from jax.experimental.pallas import tpu as pltpu


# ----------------------------- shared helpers --------------------------------

def _gelu(x):
    # TODO(synk): PyTorch F.gelu defaults to the exact erf GELU; erf is not reliably
    # lowerable in Mosaic, so the tanh approximation is used (kernel & reference agree).
    return 0.5 * x * (1.0 + jnp.tanh(0.7978845608028654 * (x + 0.044715 * x * x * x)))


def _layer_norm(x, g, b, eps=1e-6):
    # TODO(synk): eps=1e-6 assumes a THP-style EncoderLayer; PyTorch nn.LayerNorm
    # default is 1e-5 — adjust if the original Layer_volume differs.
    mu = jnp.mean(x, axis=-1, keepdims=True)
    var = jnp.mean((x - mu) ** 2, axis=-1, keepdims=True)
    return (x - mu) * lax.rsqrt(var + eps) * g + b


def positional_enc(L, D):
    """sin/cos positional encoding identical to Encoder_volume.positional_enc."""
    idx = jnp.arange(1, L + 1, dtype=jnp.float32)[:, None]                 # (L, 1)
    i = jnp.arange(D)
    pvec = jnp.power(10000.0, 2.0 * (i // 2).astype(jnp.float32) / D)      # (D,)
    r = idx / pvec[None, :]                                                # (L, D)
    return jnp.where((i % 2 == 0)[None, :], jnp.sin(r), jnp.cos(r))


def _round_up(x, m):
    return ((x + m - 1) // m) * m


def _pad_axis(x, axis, target):
    cur = x.shape[axis]
    if cur == target:
        return x
    pads = [(0, 0)] * x.ndim
    pads[axis] = (0, target - cur)
    return jnp.pad(x, pads)


# ----------------------------- Pallas kernel ---------------------------------

def encoder_stack_kernel(vol_ref, keypad_ref, npad_ref, pos_ref, proj_ref,
                         wqkv_ref, wfc_ref, w1_ref, b1_ref, w2_ref, vecs_ref,
                         out_ref, x_scr, mask_scr,
                         *, n_head, d_k, d_v, d_model, compute_dtype,
                         approx_recip=True, ln_eps=1e-6):
    layer = pl.program_id(1)
    n_layers = pl.num_programs(1)
    Bt, L, Dp = out_ref.shape
    M = Bt * L
    Hdk = n_head * d_k
    cd = compute_dtype
    neg = jnp.float32(-1e9)

    # ---- once per batch tile: volume projection + additive attention mask ----
    @pl.when(layer == 0)
    def _init():
        vol = vol_ref[...]                                     # (Bt, L, 1) f32
        proj = proj_ref[...]                                   # (2, Dp) f32
        pw, pb = proj[0:1, :], proj[1:2, :]
        x_scr[...] = vol * pw[None, :, :] + pb[None, :, :]     # enc0; pad lanes stay 0

        kp_add = keypad_ref[...] * neg                         # (Bt, 1, L)
        row = lax.broadcasted_iota(jnp.int32, (L, L), 0)
        col = lax.broadcasted_iota(jnp.int32, (L, L), 1)
        causal = jnp.where(col > row, neg, jnp.float32(0.0))   # (L, L)
        mask_scr[...] = kp_add + causal[None, :, :]            # (Bt, L, L)

    lane_mask = (lax.broadcasted_iota(jnp.int32, (1, Dp), 1) < d_model
                 ).astype(jnp.float32)

    def masked_layer_norm(x, g, b):
        # LayerNorm over the first d_model lanes only (pad lanes are zero in x, g, b).
        mu = jnp.sum(x, axis=-1, keepdims=True) * (1.0 / d_model)
        xm = (x - mu) * lane_mask
        var = jnp.sum(xm * xm, axis=-1, keepdims=True) * (1.0 / d_model)
        return xm * lax.rsqrt(var + ln_eps) * g + b

    def softmax(s):
        s = s - jnp.max(s, axis=-1, keepdims=True)
        p = jnp.exp(s)
        z = jnp.sum(p, axis=-1, keepdims=True)
        if approx_recip:
            return p * pl.reciprocal(z, approx=True)
        return p / z

    # ---- one post-norm encoder layer (dropout = eval-mode identity) ----------
    x3 = x_scr[...] + pos_ref[...][None, :, :]                 # enc_output += pos_enc
    x2 = x3.reshape(M, Dp)                                     # f32 residual / LN operand
    xc = x2.astype(cd)
    addmask = mask_scr[...]                                    # (Bt, L, L)
    npad = npad_ref[...].reshape(M, 1)

    vecs = vecs_ref[0]                                         # (8, Dp) f32 packed
    bfc, ln1g, ln1b = vecs[0:1], vecs[1:2], vecs[2:3]
    b2, ln2g, ln2b = vecs[3:4], vecs[4:5], vecs[5:6]
    b1 = b1_ref[0]                                             # (1, dip) f32

    # fused Q|K|V projection: one lane-dense matmul
    qkv = jnp.dot(xc, wqkv_ref[0], preferred_element_type=jnp.float32)     # (M, Wp)
    inv_temp = 1.0 / math.sqrt(d_k)

    # TODO(synk): static head loop (n_head small); switch to lax.fori_loop if n_head
    # grows enough for live-range pressure.
    ctx = []
    for h in range(n_head):
        qh = qkv[:, h * d_k:(h + 1) * d_k]
        kh = qkv[:, Hdk + h * d_k:Hdk + (h + 1) * d_k]
        vh = qkv[:, 2 * Hdk + h * d_v:2 * Hdk + (h + 1) * d_v]
        q3 = qh.reshape(Bt, L, d_k).astype(cd)
        k3 = kh.reshape(Bt, L, d_k).astype(cd)
        v3 = vh.reshape(Bt, L, d_v).astype(cd)
        sc = jnp.einsum('bqd,bkd->bqk', q3, k3,
                        preferred_element_type=jnp.float32) * inv_temp + addmask
        p = softmax(sc)
        oh = jnp.einsum('bqk,bkd->bqd', p.astype(cd), v3,
                        preferred_element_type=jnp.float32)                # (Bt, L, dv)
        ctx.append(oh.reshape(M, d_v))
    ocat = jnp.concatenate(ctx, axis=-1).astype(cd)            # (M, H*dv)

    # fused output projection (single matmul, K = H*dv)
    fc = jnp.dot(ocat, wfc_ref[0], preferred_element_type=jnp.float32)     # (M, Dp)

    attn = masked_layer_norm(fc + bfc + x2, ln1g, ln1b)
    x1 = attn * npad                                           # enc_output *= non_pad

    hdd = _gelu(jnp.dot(x1.astype(cd), w1_ref[0],
                        preferred_element_type=jnp.float32) + b1)
    y = jnp.dot(hdd.astype(cd), w2_ref[0],
                preferred_element_type=jnp.float32) + b2
    y = masked_layer_norm(y + x1, ln2g, ln2b) * npad           # enc_output *= non_pad

    y3 = y.reshape(Bt, L, Dp)
    x_scr[...] = y3                                            # carry to next layer

    @pl.when(layer == n_layers - 1)
    def _writeback():
        out_ref[...] = y3.astype(out_ref.dtype)


# ----------------------------- wrapper ----------------------------------------

def _device_info():
    vmem_cap = 64 * 1024 * 1024   # safe default (v7x per-TC VMEM)
    num_tc = 1
    try:
        info = pltpu.get_tpu_info()
        vmem_cap = int(getattr(info, "vmem_capacity_bytes", vmem_cap))
        for attr in ("num_cores", "num_tensorcores", "tensorcore_count", "core_count"):
            v = getattr(info, attr, None)
            if isinstance(v, int) and v > 0:
                num_tc = v
                break
    except Exception:
        pass
    return vmem_cap, num_tc


def _pick_batch_tile(B, L, Dp, dip, Wp, budget_bytes, min_tiles=1):
    """Largest divisor of B whose activation working set fits `budget_bytes`, keeping
    at least `min_tiles` batch tiles (so v7x's two TensorCores both get work)."""
    min_tiles = max(1, min(min_tiles, B))
    max_bt = max(1, B // min_tiles)
    best = 1
    for bt in range(1, max_bt + 1):
        if B % bt:
            continue
        m = bt * L
        approx = 4 * m * (6 * Dp + Wp + 2 * dip) + 12 * bt * L * L
        if approx > budget_bytes:
            break
        best = bt
        if m >= 512:
            break
    return best


def encoder_volume_forward(volume, non_pad, params, *, n_layers, n_head, d_k, d_v,
                           batch_tile=None, compute_dtype=jnp.bfloat16,
                           approx_recip=True):
    B, L, _ = volume.shape
    D = params["proj_w"].shape[0]
    d_inner = params["w1"].shape[-1]
    cd = compute_dtype
    H = n_head

    # lane-dense padded dims
    Dp = _round_up(D, 128)
    dip = _round_up(d_inner, 128)
    Wp = _round_up(H * (2 * d_k + d_v), 128)

    vmem_cap, num_tc = _device_info()
    min_tiles = num_tc if num_tc > 1 else 1
    if batch_tile is not None:
        Bt = batch_tile
    else:
        Bt = _pick_batch_tile(B, L, Dp, dip, Wp,
                              budget_bytes=max(vmem_cap // 8, 4 * 1024 * 1024),
                              min_tiles=min_tiles)
    assert B % Bt == 0

    volume = volume.astype(jnp.float32)
    non_pad = non_pad.astype(jnp.float32)
    # key-pad mask (B, 1, L): a key position is padding iff its volume sums to 0
    keypad = (jnp.sum(volume, axis=-1) == 0).astype(jnp.float32)[:, None, :]

    def padl(x, tgt):
        return _pad_axis(x, -1, tgt)

    pos = padl(positional_enc(L, D), Dp)                                         # (L, Dp)
    proj = jnp.stack([padl(params["proj_w"], Dp), padl(params["proj_b"], Dp)])   # (2, Dp)

    # fused Q|K|V weight slab (head-major within each of the Q/K/V column groups)
    q = params["wq"].transpose(0, 2, 1, 3).reshape(n_layers, D, H * d_k)
    k = params["wk"].transpose(0, 2, 1, 3).reshape(n_layers, D, H * d_k)
    v = params["wv"].transpose(0, 2, 1, 3).reshape(n_layers, D, H * d_v)
    wqkv = _pad_axis(padl(jnp.concatenate([q, k, v], axis=-1), Wp), 1, Dp).astype(cd)

    wfc = padl(params["wfc"].reshape(n_layers, H * d_v, D), Dp).astype(cd)       # (nl,Hdv,Dp)
    w1 = padl(_pad_axis(params["w1"], 1, Dp), dip).astype(cd)                    # (nl,Dp,dip)
    w2 = padl(_pad_axis(params["w2"], 1, dip), Dp).astype(cd)                    # (nl,dip,Dp)
    b1 = padl(params["b1"], dip).astype(jnp.float32)                             # (nl,1,dip)

    # pack the six per-layer (1, D) vectors into one (n_layers, 8, Dp) slab
    vecs = jnp.concatenate(
        [padl(params["bfc"], Dp), padl(params["ln1g"], Dp), padl(params["ln1b"], Dp),
         padl(params["b2"], Dp), padl(params["ln2g"], Dp), padl(params["ln2b"], Dp),
         jnp.zeros((n_layers, 2, Dp), jnp.float32)], axis=1)

    in_specs = [
        pl.BlockSpec((Bt, L, 1), lambda b, l: (b, 0, 0)),              # volume
        pl.BlockSpec((Bt, 1, L), lambda b, l: (b, 0, 0)),              # keypad
        pl.BlockSpec((Bt, L, 1), lambda b, l: (b, 0, 0)),              # non_pad
        pl.BlockSpec((L, Dp), lambda b, l: (0, 0)),                    # pos enc
        pl.BlockSpec((2, Dp), lambda b, l: (0, 0)),                    # proj w/b
        pl.BlockSpec((1, Dp, Wp), lambda b, l: (l, 0, 0)),             # fused wqkv
        pl.BlockSpec((1, H * d_v, Dp), lambda b, l: (l, 0, 0)),        # wfc (flat)
        pl.BlockSpec((1, Dp, dip), lambda b, l: (l, 0, 0)),            # w1
        pl.BlockSpec((1, 1, dip), lambda b, l: (l, 0, 0)),             # b1
        pl.BlockSpec((1, dip, Dp), lambda b, l: (l, 0, 0)),            # w2
        pl.BlockSpec((1, 8, Dp), lambda b, l: (l, 0, 0)),              # packed vectors
    ]
    out_specs = pl.BlockSpec((Bt, L, Dp), lambda b, l: (b, 0, 0))

    # VMEM budget: double-buffered per-layer weights + resident activations + temps
    wbytes = 2 * (Dp * Wp + H * d_v * Dp + 2 * Dp * dip)               # bf16 weights/layer
    vbytes = 4 * (8 * Dp + dip + 2 * Dp + L * Dp)
    act = 4 * Bt * L * (2 * Dp + L + 3)
    tmps = 4 * Bt * L * (4 * Dp + Wp + 2 * dip + 2 * L)
    needed = 2 * (wbytes + vbytes) + act + tmps
    vmem_limit = int(min(max(2 * needed, 32 * 1024 * 1024), (vmem_cap * 3) // 4))

    flops = (2 * n_layers * B * L * (Dp * Wp + H * d_v * Dp + 2 * Dp * dip)
             + 2 * n_layers * B * H * L * L * (d_k + d_v))
    transcendentals = n_layers * B * L * (H * L + dip)
    bytes_accessed = ((B // Bt) * n_layers * (wbytes + vbytes)
                      + 4 * B * L * (2 * Dp + L + 3))

    kernel = functools.partial(
        encoder_stack_kernel, n_head=H, d_k=d_k, d_v=d_v, d_model=D,
        compute_dtype=cd, approx_recip=approx_recip)

    out = pl.pallas_call(
        kernel,
        out_shape=jax.ShapeDtypeStruct((B, L, Dp), jnp.float32),
        grid_spec=pltpu.PrefetchScalarGridSpec(
            num_scalar_prefetch=0,
            grid=(B // Bt, n_layers),          # layer axis innermost (resident scratch)
            in_specs=in_specs,
            out_specs=out_specs,
            scratch_shapes=[pltpu.VMEM((Bt, L, Dp), jnp.float32),   # carried activation
                            pltpu.VMEM((Bt, L, L), jnp.float32)],   # additive attn mask
        ),
        compiler_params=pltpu.CompilerParams(
            dimension_semantics=("parallel", "arbitrary"),
            vmem_limit_bytes=vmem_limit),
        cost_estimate=pl.CostEstimate(flops=int(flops),
                                      transcendentals=int(transcendentals),
                                      bytes_accessed=int(bytes_accessed)),
    )(volume, keypad, non_pad, pos, proj, wqkv, wfc, w1, b1, w2, vecs)

    return out[:, :, :D]                       # drop lane padding (cheap XLA slice)


# ----------------------------- pure-JAX reference -----------------------------

def reference_forward(volume, non_pad, params, *, n_layers, n_head, d_k, d_v,
                      compute_dtype=jnp.bfloat16):
    B, L, _ = volume.shape
    D = params["proj_w"].shape[0]
    cd = compute_dtype
    enc = volume * params["proj_w"] + params["proj_b"]
    pos = positional_enc(L, D)
    keypad_f = (jnp.sum(volume, axis=-1) == 0).astype(jnp.float32)
    causal_add = jnp.where(jnp.triu(jnp.ones((L, L), bool), k=1), -1e9, 0.0)
    addm = keypad_f[:, None, :] * (-1e9) + causal_add[None]
    inv_temp = 1.0 / math.sqrt(d_k)
    for l in range(n_layers):
        x = enc + pos[None]
        xc = x.astype(cd)
        fc = jnp.zeros_like(x)
        for h in range(n_head):
            qh = jnp.einsum('bld,dk->blk', xc, params["wq"][l, h].astype(cd),
                            preferred_element_type=jnp.float32)
            kh = jnp.einsum('bld,dk->blk', xc, params["wk"][l, h].astype(cd),
                            preferred_element_type=jnp.float32)
            vh = jnp.einsum('bld,dk->blk', xc, params["wv"][l, h].astype(cd),
                            preferred_element_type=jnp.float32)
            sc = jnp.einsum('bqd,bkd->bqk', qh.astype(cd), kh.astype(cd),
                            preferred_element_type=jnp.float32) * inv_temp + addm
            p = jax.nn.softmax(sc, axis=-1)
            oh = jnp.einsum('bqk,bkd->bqd', p.astype(cd), vh.astype(cd),
                            preferred_element_type=jnp.float32)
            fc = fc + jnp.einsum('bld,dm->blm', oh.astype(cd),
                                 params["wfc"][l, h].astype(cd),
                                 preferred_element_type=jnp.float32)
        ao = _layer_norm(fc + params["bfc"][l] + x, params["ln1g"][l], params["ln1b"][l])
        x1 = ao * non_pad
        hdd = _gelu(jnp.einsum('bld,df->blf', x1.astype(cd), params["w1"][l].astype(cd),
                               preferred_element_type=jnp.float32) + params["b1"][l])
        y = jnp.einsum('blf,fd->bld', hdd.astype(cd), params["w2"][l].astype(cd),
                       preferred_element_type=jnp.float32) + params["b2"][l]
        y = _layer_norm(y + x1, params["ln2g"][l], params["ln2b"][l])
        enc = y * non_pad
    return enc


# ----------------------------- params & main ----------------------------------

def init_params(key, n_layers, d_model, d_inner, n_head, d_k, d_v):
    ks = jax.random.split(key, 12)
    s = 0.02
    f32 = jnp.float32
    return {
        "proj_w": s * jax.random.normal(ks[0], (d_model,), f32),
        "proj_b": s * jax.random.normal(ks[1], (d_model,), f32),
        "wq": s * jax.random.normal(ks[2], (n_layers, n_head, d_model, d_k), f32),
        "wk": s * jax.random.normal(ks[3], (n_layers, n_head, d_model, d_k), f32),
        "wv": s * jax.random.normal(ks[4], (n_layers, n_head, d_model, d_v), f32),
        "wfc": s * jax.random.normal(ks[5], (n_layers, n_head, d_v, d_model), f32),
        "bfc": s * jax.random.normal(ks[6], (n_layers, 1, d_model), f32),
        "ln1g": jnp.ones((n_layers, 1, d_model), f32),
        "ln1b": jnp.zeros((n_layers, 1, d_model), f32),
        "w1": s * jax.random.normal(ks[7], (n_layers, d_model, d_inner), f32),
        "b1": s * jax.random.normal(ks[8], (n_layers, 1, d_inner), f32),
        "w2": s * jax.random.normal(ks[9], (n_layers, d_inner, d_model), f32),
        "b2": s * jax.random.normal(ks[10], (n_layers, 1, d_model), f32),
        "ln2g": jnp.ones((n_layers, 1, d_model), f32),
        "ln2b": jnp.zeros((n_layers, 1, d_model), f32),
    }


if __name__ == "__main__":
    B, L = 2, 8
    d_model, d_inner = 32, 64
    n_layers, n_head, d_k, d_v = 2, 4, 8, 8

    key = jax.random.PRNGKey(0)
    kp, kv = jax.random.split(key)
    params = init_params(kp, n_layers, d_model, d_inner, n_head, d_k, d_v)

    volume = jax.random.normal(kv, (B, L, 1), jnp.float32)
    # introduce some padding (zero volume) in batch 1 to exercise the key-pad mask
    volume = volume.at[1, L - 2:, :].set(0.0)
    non_pad = (jnp.sum(volume, axis=-1, keepdims=True) != 0).astype(jnp.float32)

    out = encoder_volume_forward(volume, non_pad, params,
                                 n_layers=n_layers, n_head=n_head, d_k=d_k, d_v=d_v)
    out = jax.block_until_ready(out)

    ref = reference_forward(volume, non_pad, params,
                            n_layers=n_layers, n_head=n_head, d_k=d_k, d_v=d_v)
    ref = jax.block_until_ready(ref)

    assert out.shape == (B, L, d_model)
    err = jnp.max(jnp.abs(out - ref))
    assert jnp.allclose(out, ref, rtol=2e-2, atol=2e-2), f"max abs diff {err}"
    print("KERNEL_OK")
</pallas_src>

<mosaic_0001>
module attributes {stable_mosaic.version = 11 : i64} {
  func.func @encoder_stack_kernel(%arg0: i32, %arg1: i32, %arg2: memref<2x8x1xf32, #tpu.memory_space<vmem>>, %arg3: memref<2x1x8xf32, #tpu.memory_space<vmem>>, %arg4: memref<2x8x1xf32, #tpu.memory_space<vmem>>, %arg5: memref<8x128xf32, #tpu.memory_space<vmem>>, %arg6: memref<2x128xf32, #tpu.memory_space<vmem>>, %arg7: memref<1x128x128xbf16, #tpu.memory_space<vmem>>, %arg8: memref<1x32x128xbf16, #tpu.memory_space<vmem>>, %arg9: memref<1x128x128xbf16, #tpu.memory_space<vmem>>, %arg10: memref<1x1x128xf32, #tpu.memory_space<vmem>>, %arg11: memref<1x128x128xbf16, #tpu.memory_space<vmem>>, %arg12: memref<1x8x128xf32, #tpu.memory_space<vmem>>, %arg13: memref<2x8x128xf32, #tpu.memory_space<vmem>>, %arg14: memref<2x8x128xf32, #tpu.memory_space<vmem>>, %arg15: memref<2x8x8xf32, #tpu.memory_space<vmem>>) attributes {dimension_semantics = [#tpu.dimension_semantics<parallel>, #tpu.dimension_semantics<arbitrary>], iteration_bounds = array<i64: 1, 2>, scalar_prefetch = 0 : i64, scratch_operands = 2 : i64, tpu.core_type = #tpu.core_type<tc>, window_params = [{transform_indices = @transform_0, window_bounds = array<i64: 2, 8, 1>}, {transform_indices = @transform_1, window_bounds = array<i64: 2, 1, 8>}, {transform_indices = @transform_2, window_bounds = array<i64: 2, 8, 1>}, {pipeline_mode = #tpu.pipeline_mode<synchronous>, transform_indices = @transform_3, window_bounds = array<i64: 8, 128>}, {pipeline_mode = #tpu.pipeline_mode<synchronous>, transform_indices = @transform_4, window_bounds = array<i64: 2, 128>}, {transform_indices = @transform_5, window_bounds = array<i64: 1, 128, 128>}, {transform_indices = @transform_6, window_bounds = array<i64: 1, 32, 128>}, {transform_indices = @transform_7, window_bounds = array<i64: 1, 128, 128>}, {transform_indices = @transform_8, window_bounds = array<i64: 1, 1, 128>}, {transform_indices = @transform_9, window_bounds = array<i64: 1, 128, 128>}, {transform_indices = @transform_10, window_bounds = array<i64: 1, 8, 128>}, {transform_indices = @transform_11, window_bounds = array<i64: 2, 8, 128>}]} {
    %c0_i32 = arith.constant 0 : i32
    %0 = arith.cmpi eq, %arg1, %c0_i32 : i32
    %1 = arith.extui %0 : i1 to i32
    %cst = arith.constant -1.000000e+09 : f32
    %c0_i32_0 = arith.constant 0 : i32
    %2 = arith.cmpi ne, %1, %c0_i32_0 : i32
    scf.if %2 {
      %c0_71 = arith.constant 0 : index
      %c0_72 = arith.constant 0 : index
      %c0_73 = arith.constant 0 : index
      %222 = vector.load %arg2[%c0_71, %c0_72, %c0_73] : memref<2x8x1xf32, #tpu.memory_space<vmem>>, vector<2x8x1xf32>
      %c0_74 = arith.constant 0 : index
      %c0_75 = arith.constant 0 : index
      %223 = vector.load %arg6[%c0_74, %c0_75] : memref<2x128xf32, #tpu.memory_space<vmem>>, vector<2x128xf32>
      %224 = vector.extract_strided_slice %223 {offsets = [0, 0], sizes = [1, 128], strides = [1, 1]} : vector<2x128xf32> to vector<1x128xf32>
      %225 = vector.extract_strided_slice %223 {offsets = [1, 0], sizes = [1, 128], strides = [1, 1]} : vector<2x128xf32> to vector<1x128xf32>
      %226 = vector.shape_cast %224 : vector<1x128xf32> to vector<1x1x128xf32>
      %227 = vector.broadcast %222 : vector<2x8x1xf32> to vector<2x8x128xf32>
      %228 = vector.broadcast %226 : vector<1x1x128xf32> to vector<2x8x128xf32>
      %229 = arith.mulf %227, %228 : vector<2x8x128xf32>
      %230 = vector.shape_cast %225 : vector<1x128xf32> to vector<1x1x128xf32>
      %231 = vector.broadcast %230 : vector<1x1x128xf32> to vector<2x8x128xf32>
      %232 = arith.addf %229, %231 : vector<2x8x128xf32>
      %c0_76 = arith.constant 0 : index
      %c0_77 = arith.constant 0 : index
      %c0_78 = arith.constant 0 : index
      %233 = vector.load %arg14[%c0_76, %c0_77, %c0_78] : memref<2x8x128xf32, #tpu.memory_space<vmem>>, vector<2x8x128xf32>
      tpu.vector_store %arg14[%c0_76, %c0_77, %c0_78], %232 {strides = array<i32>} : memref<2x8x128xf32, #tpu.memory_space<vmem>>, vector<2x8x128xf32>,
      %c0_79 = arith.constant 0 : index
      %c0_80 = arith.constant 0 : index
      %c0_81 = arith.constant 0 : index
      %234 = vector.load %arg3[%c0_79, %c0_80, %c0_81] : memref<2x1x8xf32, #tpu.memory_space<vmem>>, vector<2x1x8xf32>
      %235 = vector.broadcast %cst : f32 to vector<2x1x8xf32>
      %236 = arith.mulf %234, %235 : vector<2x1x8xf32>
      %237 = tpu.iota {dimensions = array<i32: 0>} : vector<8x8xi32>
      %238 = tpu.iota {dimensions = array<i32: 1>} : vector<8x8xi32>
      %239 = arith.cmpi sgt, %238, %237 : vector<8x8xi32>
      %cst_82 = arith.constant 0.000000e+00 : f32
      %240 = vector.broadcast %cst : f32 to vector<8x8xf32>
      %241 = vector.broadcast %cst_82 : f32 to vector<8x8xf32>
      %242 = arith.select %239, %240, %241 : vector<8x8xi1>, vector<8x8xf32>
      %243 = vector.shape_cast %242 : vector<8x8xf32> to vector<1x8x8xf32>
      %244 = vector.broadcast %236 : vector<2x1x8xf32> to vector<2x8x8xf32>
      %245 = vector.broadcast %243 : vector<1x8x8xf32> to vector<2x8x8xf32>
      %246 = arith.addf %244, %245 : vector<2x8x8xf32>
      %c0_83 = arith.constant 0 : index
      %c0_84 = arith.constant 0 : index
      %c0_85 = arith.constant 0 : index
      %247 = vector.load %arg15[%c0_83, %c0_84, %c0_85] : memref<2x8x8xf32, #tpu.memory_space<vmem>>, vector<2x8x8xf32>
      tpu.vector_store %arg15[%c0_83, %c0_84, %c0_85], %246 {strides = array<i32>} : memref<2x8x8xf32, #tpu.memory_space<vmem>>, vector<2x8x8xf32>,
    } else {
    }
    %3 = tpu.iota {dimensions = array<i32: 1>} : vector<1x128xi32>
    %c32_i32 = arith.constant 32 : i32
    %4 = vector.broadcast %c32_i32 : i32 to vector<1x128xi32>
    %5 = arith.cmpi slt, %3, %4 : vector<1x128xi32>
    %6 = arith.extui %5 : vector<1x128xi1> to vector<1x128xi32>
    %7 = arith.sitofp %6 : vector<1x128xi32> to vector<1x128xf32>
    %c0 = arith.constant 0 : index
    %c0_1 = arith.constant 0 : index
    %c0_2 = arith.constant 0 : index
    %8 = vector.load %arg14[%c0, %c0_1, %c0_2] : memref<2x8x128xf32, #tpu.memory_space<vmem>>, vector<2x8x128xf32>
    %c0_3 = arith.constant 0 : index
    %c0_4 = arith.constant 0 : index
    %9 = vector.load %arg5[%c0_3, %c0_4] : memref<8x128xf32, #tpu.memory_space<vmem>>, vector<8x128xf32>
    %10 = vector.shape_cast %9 : vector<8x128xf32> to vector<1x8x128xf32>
    %11 = vector.broadcast %10 : vector<1x8x128xf32> to vector<2x8x128xf32>
    %12 = arith.addf %8, %11 : vector<2x8x128xf32>
    %13 = vector.shape_cast %12 : vector<2x8x128xf32> to vector<16x128xf32>
    %14 = arith.truncf %13 : vector<16x128xf32> to vector<16x128xbf16>
    %c0_5 = arith.constant 0 : index
    %c0_6 = arith.constant 0 : index
    %c0_7 = arith.constant 0 : index
    %15 = vector.load %arg15[%c0_5, %c0_6, %c0_7] : memref<2x8x8xf32, #tpu.memory_space<vmem>>, vector<2x8x8xf32>
    %c0_8 = arith.constant 0 : index
    %c0_9 = arith.constant 0 : index
    %c0_10 = arith.constant 0 : index
    %16 = vector.load %arg4[%c0_8, %c0_9, %c0_10] : memref<2x8x1xf32, #tpu.memory_space<vmem>>, vector<2x8x1xf32>
    %17 = vector.shape_cast %16 : vector<2x8x1xf32> to vector<16x1xf32>
    %c0_11 = arith.constant 0 : index
    %c0_12 = arith.constant 0 : index
    %c0_13 = arith.constant 0 : index
    %18 = vector.load %arg12[%c0_11, %c0_12, %c0_13] : memref<1x8x128xf32, #tpu.memory_space<vmem>>, vector<1x8x128xf32>
    %19 = vector.shape_cast %18 : vector<1x8x128xf32> to vector<8x128xf32>
    %20 = vector.extract_strided_slice %19 {offsets = [0, 0], sizes = [1, 128], strides = [1, 1]} : vector<8x128xf32> to vector<1x128xf32>
    %21 = vector.extract_strided_slice %19 {offsets = [1, 0], sizes = [1, 128], strides = [1, 1]} : vector<8x128xf32> to vector<1x128xf32>
    %22 = vector.extract_strided_slice %19 {offsets = [2, 0], sizes = [1, 128], strides = [1, 1]} : vector<8x128xf32> to vector<1x128xf32>
    %23 = vector.extract_strided_slice %19 {offsets = [3, 0], sizes = [1, 128], strides = [1, 1]} : vector<8x128xf32> to vector<1x128xf32>
    %24 = vector.extract_strided_slice %19 {offsets = [4, 0], sizes = [1, 128], strides = [1, 1]} : vector<8x128xf32> to vector<1x128xf32>
    %25 = vector.extract_strided_slice %19 {offsets = [5, 0], sizes = [1, 128], strides = [1, 1]} : vector<8x128xf32> to vector<1x128xf32>
    %c0_14 = arith.constant 0 : index
    %c0_15 = arith.constant 0 : index
    %c0_16 = arith.constant 0 : index
    %26 = vector.load %arg10[%c0_14, %c0_15, %c0_16] : memref<1x1x128xf32, #tpu.memory_space<vmem>>, vector<1x1x128xf32>
    %27 = vector.shape_cast %26 : vector<1x1x128xf32> to vector<1x128xf32>
    %c0_17 = arith.constant 0 : index
    %c0_18 = arith.constant 0 : index
    %c0_19 = arith.constant 0 : index
    %28 = vector.load %arg7[%c0_17, %c0_18, %c0_19] : memref<1x128x128xbf16, #tpu.memory_space<vmem>>, vector<1x128x128xbf16>
    %29 = vector.shape_cast %28 : vector<1x128x128xbf16> to vector<128x128xbf16>
    %cst_20 = arith.constant dense<0.000000e+00> : vector<16x128xf32>
    %30 = tpu.matmul %14, %29, %cst_20 {dimension_numbers = #tpu.dot_dimension_numbers<[1], [0], [0], [1], [0, 0, 1, 1], [], []>} : vector<16x128xbf16>, vector<128x128xbf16>, vector<16x128xf32> -> vector<16x128xf32>
    %31 = vector.extract_strided_slice %30 {offsets = [0, 0], sizes = [16, 8], strides = [1, 1]} : vector<16x128xf32> to vector<16x8xf32>
    %32 = vector.extract_strided_slice %30 {offsets = [0, 32], sizes = [16, 8], strides = [1, 1]} : vector<16x128xf32> to vector<16x8xf32>
    %33 = vector.extract_strided_slice %30 {offsets = [0, 64], sizes = [16, 8], strides = [1, 1]} : vector<16x128xf32> to vector<16x8xf32>
    %34 = vector.shape_cast %31 : vector<16x8xf32> to vector<2x8x8xf32>
    %35 = arith.truncf %34 : vector<2x8x8xf32> to vector<2x8x8xbf16>
    %36 = vector.shape_cast %32 : vector<16x8xf32> to vector<2x8x8xf32>
    %37 = arith.truncf %36 : vector<2x8x8xf32> to vector<2x8x8xbf16>
    %38 = vector.shape_cast %33 : vector<16x8xf32> to vector<2x8x8xf32>
    %39 = arith.truncf %38 : vector<2x8x8xf32> to vector<2x8x8xbf16>
    "tpu.trace_start"() <{level = 10 : i32, message = "bqd,bkd->bqk"}> : () -> ()
    %cst_21 = arith.constant dense<0.000000e+00> : vector<2x8x8xf32>
    %40 = tpu.matmul %35, %37, %cst_21 {dimension_numbers = #tpu.dot_dimension_numbers<[2], [2], [1], [1], [0, 0, 0, 1, 1, 1], [0], [0]>} : vector<2x8x8xbf16>, vector<2x8x8xbf16>, vector<2x8x8xf32> -> vector<2x8x8xf32>
    "tpu.trace_stop"() : () -> ()
    %cst_22 = arith.constant 0.353553385 : f32
    %41 = vector.broadcast %cst_22 : f32 to vector<2x8x8xf32>
    %42 = arith.mulf %40, %41 : vector<2x8x8xf32>
    %43 = arith.addf %42, %15 : vector<2x8x8xf32>
    %cst_23 = arith.constant dense<0xFF800000> : vector<2x8xf32>
    %44 = vector.multi_reduction <maximumf>, %43, %cst_23 [2] : vector<2x8x8xf32> to vector<2x8xf32>
    %45 = vector.shape_cast %44 : vector<2x8xf32> to vector<2x8x1xf32>
    %46 = vector.broadcast %45 : vector<2x8x1xf32> to vector<2x8x8xf32>
    %47 = arith.subf %43, %46 : vector<2x8x8xf32>
    %48 = math.exp %47 : vector<2x8x8xf32>
    %cst_24 = arith.constant dense<0.000000e+00> : vector<2x8xf32>
    %49 = vector.multi_reduction <add>, %48, %cst_24 [2] : vector<2x8x8xf32> to vector<2x8xf32>
    %50 = vector.shape_cast %49 : vector<2x8xf32> to vector<2x8x1xf32>
    %51 = tpu.reciprocal %50 {approx = true} : vector<2x8x1xf32> -> vector<2x8x1xf32>
    %52 = vector.broadcast %51 : vector<2x8x1xf32> to vector<2x8x8xf32>
    %53 = arith.mulf %48, %52 : vector<2x8x8xf32>
    %54 = arith.truncf %53 : vector<2x8x8xf32> to vector<2x8x8xbf16>
    "tpu.trace_start"() <{level = 10 : i32, message = "bqk,bkd->bqd"}> : () -> ()
    %cst_25 = arith.constant dense<0.000000e+00> : vector<2x8x8xf32>
    %55 = tpu.matmul %54, %39, %cst_25 {dimension_numbers = #tpu.dot_dimension_numbers<[2], [1], [1], [2], [0, 0, 0, 1, 1, 2], [0], [0]>} : vector<2x8x8xbf16>, vector<2x8x8xbf16>, vector<2x8x8xf32> -> vector<2x8x8xf32>
    "tpu.trace_stop"() : () -> ()
    %56 = vector.shape_cast %55 : vector<2x8x8xf32> to vector<16x8xf32>
    %57 = vector.extract_strided_slice %30 {offsets = [0, 8], sizes = [16, 8], strides = [1, 1]} : vector<16x128xf32> to vector<16x8xf32>
    %58 = vector.extract_strided_slice %30 {offsets = [0, 40], sizes = [16, 8], strides = [1, 1]} : vector<16x128xf32> to vector<16x8xf32>
    %59 = vector.extract_strided_slice %30 {offsets = [0, 72], sizes = [16, 8], strides = [1, 1]} : vector<16x128xf32> to vector<16x8xf32>
    %60 = vector.shape_cast %57 : vector<16x8xf32> to vector<2x8x8xf32>
    %61 = arith.truncf %60 : vector<2x8x8xf32> to vector<2x8x8xbf16>
    %62 = vector.shape_cast %58 : vector<16x8xf32> to vector<2x8x8xf32>
    %63 = arith.truncf %62 : vector<2x8x8xf32> to vector<2x8x8xbf16>
    %64 = vector.shape_cast %59 : vector<16x8xf32> to vector<2x8x8xf32>
    %65 = arith.truncf %64 : vector<2x8x8xf32> to vector<2x8x8xbf16>
    "tpu.trace_start"() <{level = 10 : i32, message = "bqd,bkd->bqk"}> : () -> ()
    %cst_26 = arith.constant dense<0.000000e+00> : vector<2x8x8xf32>
    %66 = tpu.matmul %61, %63, %cst_26 {dimension_numbers = #tpu.dot_dimension_numbers<[2], [2], [1], [1], [0, 0, 0, 1, 1, 1], [0], [0]>} : vector<2x8x8xbf16>, vector<2x8x8xbf16>, vector<2x8x8xf32> -> vector<2x8x8xf32>
    "tpu.trace_stop"() : () -> ()
    %cst_27 = arith.constant 0.353553385 : f32
    %67 = vector.broadcast %cst_27 : f32 to vector<2x8x8xf32>
    %68 = arith.mulf %66, %67 : vector<2x8x8xf32>
    %69 = arith.addf %68, %15 : vector<2x8x8xf32>
    %cst_28 = arith.constant dense<0xFF800000> : vector<2x8xf32>
    %70 = vector.multi_reduction <maximumf>, %69, %cst_28 [2] : vector<2x8x8xf32> to vector<2x8xf32>
    %71 = vector.shape_cast %70 : vector<2x8xf32> to vector<2x8x1xf32>
    %72 = vector.broadcast %71 : vector<2x8x1xf32> to vector<2x8x8xf32>
    %73 = arith.subf %69, %72 : vector<2x8x8xf32>
    %74 = math.exp %73 : vector<2x8x8xf32>
    %cst_29 = arith.constant dense<0.000000e+00> : vector<2x8xf32>
    %75 = vector.multi_reduction <add>, %74, %cst_29 [2] : vector<2x8x8xf32> to vector<2x8xf32>
    %76 = vector.shape_cast %75 : vector<2x8xf32> to vector<2x8x1xf32>
    %77 = tpu.reciprocal %76 {approx = true} : vector<2x8x1xf32> -> vector<2x8x1xf32>
    %78 = vector.broadcast %77 : vector<2x8x1xf32> to vector<2x8x8xf32>
    %79 = arith.mulf %74, %78 : vector<2x8x8xf32>
    %80 = arith.truncf %79 : vector<2x8x8xf32> to vector<2x8x8xbf16>
    "tpu.trace_start"() <{level = 10 : i32, message = "bqk,bkd->bqd"}> : () -> ()
    %cst_30 = arith.constant dense<0.000000e+00> : vector<2x8x8xf32>
    %81 = tpu.matmul %80, %65, %cst_30 {dimension_numbers = #tpu.dot_dimension_numbers<[2], [1], [1], [2], [0, 0, 0, 1, 1, 2], [0], [0]>} : vector<2x8x8xbf16>, vector<2x8x8xbf16>, vector<2x8x8xf32> -> vector<2x8x8xf32>
    "tpu.trace_stop"() : () -> ()
    %82 = vector.shape_cast %81 : vector<2x8x8xf32> to vector<16x8xf32>
    %83 = vector.extract_strided_slice %30 {offsets = [0, 16], sizes = [16, 8], strides = [1, 1]} : vector<16x128xf32> to vector<16x8xf32>
    %84 = vector.extract_strided_slice %30 {offsets = [0, 48], sizes = [16, 8], strides = [1, 1]} : vector<16x128xf32> to vector<16x8xf32>
    %85 = vector.extract_strided_slice %30 {offsets = [0, 80], sizes = [16, 8], strides = [1, 1]} : vector<16x128xf32> to vector<16x8xf32>
    %86 = vector.shape_cast %83 : vector<16x8xf32> to vector<2x8x8xf32>
    %87 = arith.truncf %86 : vector<2x8x8xf32> to vector<2x8x8xbf16>
    %88 = vector.shape_cast %84 : vector<16x8xf32> to vector<2x8x8xf32>
    %89 = arith.truncf %88 : vector<2x8x8xf32> to vector<2x8x8xbf16>
    %90 = vector.shape_cast %85 : vector<16x8xf32> to vector<2x8x8xf32>
    %91 = arith.truncf %90 : vector<2x8x8xf32> to vector<2x8x8xbf16>
    "tpu.trace_start"() <{level = 10 : i32, message = "bqd,bkd->bqk"}> : () -> ()
    %cst_31 = arith.constant dense<0.000000e+00> : vector<2x8x8xf32>
    %92 = tpu.matmul %87, %89, %cst_31 {dimension_numbers = #tpu.dot_dimension_numbers<[2], [2], [1], [1], [0, 0, 0, 1, 1, 1], [0], [0]>} : vector<2x8x8xbf16>, vector<2x8x8xbf16>, vector<2x8x8xf32> -> vector<2x8x8xf32>
    "tpu.trace_stop"() : () -> ()
    %cst_32 = arith.constant 0.353553385 : f32
    %93 = vector.broadcast %cst_32 : f32 to vector<2x8x8xf32>
    %94 = arith.mulf %92, %93 : vector<2x8x8xf32>
    %95 = arith.addf %94, %15 : vector<2x8x8xf32>
    %cst_33 = arith.constant dense<0xFF800000> : vector<2x8xf32>
    %96 = vector.multi_reduction <maximumf>, %95, %cst_33 [2] : vector<2x8x8xf32> to vector<2x8xf32>
    %97 = vector.shape_cast %96 : vector<2x8xf32> to vector<2x8x1xf32>
    %98 = vector.broadcast %97 : vector<2x8x1xf32> to vector<2x8x8xf32>
    %99 = arith.subf %95, %98 : vector<2x8x8xf32>
    %100 = math.exp %99 : vector<2x8x8xf32>
    %cst_34 = arith.constant dense<0.000000e+00> : vector<2x8xf32>
    %101 = vector.multi_reduction <add>, %100, %cst_34 [2] : vector<2x8x8xf32> to vector<2x8xf32>
    %102 = vector.shape_cast %101 : vector<2x8xf32> to vector<2x8x1xf32>
    %103 = tpu.reciprocal %102 {approx = true} : vector<2x8x1xf32> -> vector<2x8x1xf32>
    %104 = vector.broadcast %103 : vector<2x8x1xf32> to vector<2x8x8xf32>
    %105 = arith.mulf %100, %104 : vector<2x8x8xf32>
    %106 = arith.truncf %105 : vector<2x8x8xf32> to vector<2x8x8xbf16>
    "tpu.trace_start"() <{level = 10 : i32, message = "bqk,bkd->bqd"}> : () -> ()
    %cst_35 = arith.constant dense<0.000000e+00> : vector<2x8x8xf32>
    %107 = tpu.matmul %106, %91, %cst_35 {dimension_numbers = #tpu.dot_dimension_numbers<[2], [1], [1], [2], [0, 0, 0, 1, 1, 2], [0], [0]>} : vector<2x8x8xbf16>, vector<2x8x8xbf16>, vector<2x8x8xf32> -> vector<2x8x8xf32>
    "tpu.trace_stop"() : () -> ()
    %108 = vector.shape_cast %107 : vector<2x8x8xf32> to vector<16x8xf32>
    %109 = vector.extract_strided_slice %30 {offsets = [0, 24], sizes = [16, 8], strides = [1, 1]} : vector<16x128xf32> to vector<16x8xf32>
    %110 = vector.extract_strided_slice %30 {offsets = [0, 56], sizes = [16, 8], strides = [1, 1]} : vector<16x128xf32> to vector<16x8xf32>
    %111 = vector.extract_strided_slice %30 {offsets = [0, 88], sizes = [16, 8], strides = [1, 1]} : vector<16x128xf32> to vector<16x8xf32>
    %112 = vector.shape_cast %109 : vector<16x8xf32> to vector<2x8x8xf32>
    %113 = arith.truncf %112 : vector<2x8x8xf32> to vector<2x8x8xbf16>
    %114 = vector.shape_cast %110 : vector<16x8xf32> to vector<2x8x8xf32>
    %115 = arith.truncf %114 : vector<2x8x8xf32> to vector<2x8x8xbf16>
    %116 = vector.shape_cast %111 : vector<16x8xf32> to vector<2x8x8xf32>
    %117 = arith.truncf %116 : vector<2x8x8xf32> to vector<2x8x8xbf16>
    "tpu.trace_start"() <{level = 10 : i32, message = "bqd,bkd->bqk"}> : () -> ()
    %cst_36 = arith.constant dense<0.000000e+00> : vector<2x8x8xf32>
    %118 = tpu.matmul %113, %115, %cst_36 {dimension_numbers = #tpu.dot_dimension_numbers<[2], [2], [1], [1], [0, 0, 0, 1, 1, 1], [0], [0]>} : vector<2x8x8xbf16>, vector<2x8x8xbf16>, vector<2x8x8xf32> -> vector<2x8x8xf32>
    "tpu.trace_stop"() : () -> ()
    %cst_37 = arith.constant 0.353553385 : f32
    %119 = vector.broadcast %cst_37 : f32 to vector<2x8x8xf32>
    %120 = arith.mulf %118, %119 : vector<2x8x8xf32>
    %121 = arith.addf %120, %15 : vector<2x8x8xf32>
    %cst_38 = arith.constant dense<0xFF800000> : vector<2x8xf32>
    %122 = vector.multi_reduction <maximumf>, %121, %cst_38 [2] : vector<2x8x8xf32> to vector<2x8xf32>
    %123 = vector.shape_cast %122 : vector<2x8xf32> to vector<2x8x1xf32>
    %124 = vector.broadcast %123 : vector<2x8x1xf32> to vector<2x8x8xf32>
    %125 = arith.subf %121, %124 : vector<2x8x8xf32>
    %126 = math.exp %125 : vector<2x8x8xf32>
    %cst_39 = arith.constant dense<0.000000e+00> : vector<2x8xf32>
    %127 = vector.multi_reduction <add>, %126, %cst_39 [2] : vector<2x8x8xf32> to vector<2x8xf32>
    %128 = vector.shape_cast %127 : vector<2x8xf32> to vector<2x8x1xf32>
    %129 = tpu.reciprocal %128 {approx = true} : vector<2x8x1xf32> -> vector<2x8x1xf32>
    %130 = vector.broadcast %129 : vector<2x8x1xf32> to vector<2x8x8xf32>
    %131 = arith.mulf %126, %130 : vector<2x8x8xf32>
    %132 = arith.truncf %131 : vector<2x8x8xf32> to vector<2x8x8xbf16>
    "tpu.trace_start"() <{level = 10 : i32, message = "bqk,bkd->bqd"}> : () -> ()
    %cst_40 = arith.constant dense<0.000000e+00> : vector<2x8x8xf32>
    %133 = tpu.matmul %132, %117, %cst_40 {dimension_numbers = #tpu.dot_dimension_numbers<[2], [1], [1], [2], [0, 0, 0, 1, 1, 2], [0], [0]>} : vector<2x8x8xbf16>, vector<2x8x8xbf16>, vector<2x8x8xf32> -> vector<2x8x8xf32>
    "tpu.trace_stop"() : () -> ()
    %134 = vector.shape_cast %133 : vector<2x8x8xf32> to vector<16x8xf32>
    %135 = tpu.concatenate %56, %82, %108, %134 in 1 : vector<16x8xf32>, vector<16x8xf32>, vector<16x8xf32>, vector<16x8xf32> -> vector<16x32xf32>
    %136 = arith.truncf %135 : vector<16x32xf32> to vector<16x32xbf16>
    %c0_41 = arith.constant 0 : index
    %c0_42 = arith.constant 0 : index
    %c0_43 = arith.constant 0 : index
    %137 = vector.load %arg8[%c0_41, %c0_42, %c0_43] : memref<1x32x128xbf16, #tpu.memory_space<vmem>>, vector<1x32x128xbf16>
    %138 = vector.shape_cast %137 : vector<1x32x128xbf16> to vector<32x128xbf16>
    %cst_44 = arith.constant dense<0.000000e+00> : vector<16x128xf32>
    %139 = tpu.matmul %136, %138, %cst_44 {dimension_numbers = #tpu.dot_dimension_numbers<[1], [0], [0], [1], [0, 0, 1, 1], [], []>} : vector<16x32xbf16>, vector<32x128xbf16>, vector<16x128xf32> -> vector<16x128xf32>
    %140 = vector.broadcast %20 : vector<1x128xf32> to vector<16x128xf32>
    %141 = arith.addf %139, %140 : vector<16x128xf32>
    %142 = arith.addf %141, %13 : vector<16x128xf32>
    %cst_45 = arith.constant dense<0.000000e+00> : vector<16xf32>
    %143 = vector.multi_reduction <add>, %142, %cst_45 [1] : vector<16x128xf32> to vector<16xf32>
    %144 = vector.shape_cast %143 : vector<16xf32> to vector<16x1xf32>
    %cst_46 = arith.constant 3.125000e-02 : f32
    %145 = vector.broadcast %cst_46 : f32 to vector<16x1xf32>
    %146 = arith.mulf %144, %145 : vector<16x1xf32>
    %147 = vector.broadcast %146 : vector<16x1xf32> to vector<16x128xf32>
    %148 = arith.subf %142, %147 : vector<16x128xf32>
    %149 = vector.broadcast %7 : vector<1x128xf32> to vector<16x128xf32>
    %150 = arith.mulf %148, %149 : vector<16x128xf32>
    %151 = arith.mulf %150, %150 : vector<16x128xf32>
    %cst_47 = arith.constant dense<0.000000e+00> : vector<16xf32>
    %152 = vector.multi_reduction <add>, %151, %cst_47 [1] : vector<16x128xf32> to vector<16xf32>
    %153 = vector.shape_cast %152 : vector<16xf32> to vector<16x1xf32>
    %cst_48 = arith.constant 3.125000e-02 : f32
    %154 = vector.broadcast %cst_48 : f32 to vector<16x1xf32>
    %155 = arith.mulf %153, %154 : vector<16x1xf32>
    %cst_49 = arith.constant 9.99999997E-7 : f32
    %156 = vector.broadcast %cst_49 : f32 to vector<16x1xf32>
    %157 = arith.addf %155, %156 : vector<16x1xf32>
    %158 = math.rsqrt %157 : vector<16x1xf32>
    %159 = vector.broadcast %158 : vector<16x1xf32> to vector<16x128xf32>
    %160 = arith.mulf %150, %159 : vector<16x128xf32>
    %161 = vector.broadcast %21 : vector<1x128xf32> to vector<16x128xf32>
    %162 = arith.mulf %160, %161 : vector<16x128xf32>
    %163 = vector.broadcast %22 : vector<1x128xf32> to vector<16x128xf32>
    %164 = arith.addf %162, %163 : vector<16x128xf32>
    %165 = vector.broadcast %17 : vector<16x1xf32> to vector<16x128xf32>
    %166 = arith.mulf %164, %165 : vector<16x128xf32>
    %167 = arith.truncf %166 : vector<16x128xf32> to vector<16x128xbf16>
    %c0_50 = arith.constant 0 : index
    %c0_51 = arith.constant 0 : index
    %c0_52 = arith.constant 0 : index
    %168 = vector.load %arg9[%c0_50, %c0_51, %c0_52] : memref<1x128x128xbf16, #tpu.memory_space<vmem>>, vector<1x128x128xbf16>
    %169 = vector.shape_cast %168 : vector<1x128x128xbf16> to vector<128x128xbf16>
    %cst_53 = arith.constant dense<0.000000e+00> : vector<16x128xf32>
    %170 = tpu.matmul %167, %169, %cst_53 {dimension_numbers = #tpu.dot_dimension_numbers<[1], [0], [0], [1], [0, 0, 1, 1], [], []>} : vector<16x128xbf16>, vector<128x128xbf16>, vector<16x128xf32> -> vector<16x128xf32>
    %171 = vector.broadcast %27 : vector<1x128xf32> to vector<16x128xf32>
    %172 = arith.addf %170, %171 : vector<16x128xf32>
    %cst_54 = arith.constant 5.000000e-01 : f32
    %173 = vector.broadcast %cst_54 : f32 to vector<16x128xf32>
    %174 = arith.mulf %173, %172 : vector<16x128xf32>
    %cst_55 = arith.constant 4.471500e-02 : f32
    %175 = vector.broadcast %cst_55 : f32 to vector<16x128xf32>
    %176 = arith.mulf %175, %172 : vector<16x128xf32>
    %177 = arith.mulf %176, %172 : vector<16x128xf32>
    %178 = arith.mulf %177, %172 : vector<16x128xf32>
    %179 = arith.addf %172, %178 : vector<16x128xf32>
    %cst_56 = arith.constant 0.797884583 : f32
    %180 = vector.broadcast %cst_56 : f32 to vector<16x128xf32>
    %181 = arith.mulf %180, %179 : vector<16x128xf32>
    %182 = math.tanh %181 : vector<16x128xf32>
    %cst_57 = arith.constant 1.000000e+00 : f32
    %183 = vector.broadcast %cst_57 : f32 to vector<16x128xf32>
    %184 = arith.addf %183, %182 : vector<16x128xf32>
    %185 = arith.mulf %174, %184 : vector<16x128xf32>
    %186 = arith.truncf %185 : vector<16x128xf32> to vector<16x128xbf16>
    %c0_58 = arith.constant 0 : index
    %c0_59 = arith.constant 0 : index
    %c0_60 = arith.constant 0 : index
    %187 = vector.load %arg11[%c0_58, %c0_59, %c0_60] : memref<1x128x128xbf16, #tpu.memory_space<vmem>>, vector<1x128x128xbf16>
    %188 = vector.shape_cast %187 : vector<1x128x128xbf16> to vector<128x128xbf16>
    %cst_61 = arith.constant dense<0.000000e+00> : vector<16x128xf32>
    %189 = tpu.matmul %186, %188, %cst_61 {dimension_numbers = #tpu.dot_dimension_numbers<[1], [0], [0], [1], [0, 0, 1, 1], [], []>} : vector<16x128xbf16>, vector<128x128xbf16>, vector<16x128xf32> -> vector<16x128xf32>
    %190 = vector.broadcast %23 : vector<1x128xf32> to vector<16x128xf32>
    %191 = arith.addf %189, %190 : vector<16x128xf32>
    %192 = arith.addf %191, %166 : vector<16x128xf32>
    %cst_62 = arith.constant dense<0.000000e+00> : vector<16xf32>
    %193 = vector.multi_reduction <add>, %192, %cst_62 [1] : vector<16x128xf32> to vector<16xf32>
    %194 = vector.shape_cast %193 : vector<16xf32> to vector<16x1xf32>
    %cst_63 = arith.constant 3.125000e-02 : f32
    %195 = vector.broadcast %cst_63 : f32 to vector<16x1xf32>
    %196 = arith.mulf %194, %195 : vector<16x1xf32>
    %197 = vector.broadcast %196 : vector<16x1xf32> to vector<16x128xf32>
    %198 = arith.subf %192, %197 : vector<16x128xf32>
    %199 = vector.broadcast %7 : vector<1x128xf32> to vector<16x128xf32>
    %200 = arith.mulf %198, %199 : vector<16x128xf32>
    %201 = arith.mulf %200, %200 : vector<16x128xf32>
    %cst_64 = arith.constant dense<0.000000e+00> : vector<16xf32>
    %202 = vector.multi_reduction <add>, %201, %cst_64 [1] : vector<16x128xf32> to vector<16xf32>
    %203 = vector.shape_cast %202 : vector<16xf32> to vector<16x1xf32>
    %cst_65 = arith.constant 3.125000e-02 : f32
    %204 = vector.broadcast %cst_65 : f32 to vector<16x1xf32>
    %205 = arith.mulf %203, %204 : vector<16x1xf32>
    %cst_66 = arith.constant 9.99999997E-7 : f32
    %206 = vector.broadcast %cst_66 : f32 to vector<16x1xf32>
    %207 = arith.addf %205, %206 : vector<16x1xf32>
    %208 = math.rsqrt %207 : vector<16x1xf32>
    %209 = vector.broadcast %208 : vector<16x1xf32> to vector<16x128xf32>
    %210 = arith.mulf %200, %209 : vector<16x128xf32>
    %211 = vector.broadcast %24 : vector<1x128xf32> to vector<16x128xf32>
    %212 = arith.mulf %210, %211 : vector<16x128xf32>
    %213 = vector.broadcast %25 : vector<1x128xf32> to vector<16x128xf32>
    %214 = arith.addf %212, %213 : vector<16x128xf32>
    %215 = vector.broadcast %17 : vector<16x1xf32> to vector<16x128xf32>
    %216 = arith.mulf %214, %215 : vector<16x128xf32>
    %217 = vector.shape_cast %216 : vector<16x128xf32> to vector<2x8x128xf32>
    %c0_67 = arith.constant 0 : index
    %c0_68 = arith.constant 0 : index
    %c0_69 = arith.constant 0 : index
    %218 = vector.load %arg14[%c0_67, %c0_68, %c0_69] : memref<2x8x128xf32, #tpu.memory_space<vmem>>, vector<2x8x128xf32>
    tpu.vector_store %arg14[%c0_67, %c0_68, %c0_69], %217 {strides = array<i32>} : memref<2x8x128xf32, #tpu.memory_space<vmem>>, vector<2x8x128xf32>,
    %c1_i32 = arith.constant 1 : i32
    %219 = arith.cmpi eq, %arg1, %c1_i32 : i32
    %220 = arith.extui %219 : i1 to i32
    %c0_i32_70 = arith.constant 0 : i32
    %221 = arith.cmpi ne, %220, %c0_i32_70 : i32
    scf.if %221 {
      %c0_71 = arith.constant 0 : index
      %c0_72 = arith.constant 0 : index
      %c0_73 = arith.constant 0 : index
      %222 = vector.load %arg13[%c0_71, %c0_72, %c0_73] : memref<2x8x128xf32, #tpu.memory_space<vmem>>, vector<2x8x128xf32>
      tpu.vector_store %arg13[%c0_71, %c0_72, %c0_73], %217 {strides = array<i32>} : memref<2x8x128xf32, #tpu.memory_space<vmem>>, vector<2x8x128xf32>,
    } else {
    }
    return
  }
  func.func @transform_0(%arg0: i32, %arg1: i32) -> (i32, i32, i32) {
    %c0_i32 = arith.constant 0 : i32
    %c0_i32_0 = arith.constant 0 : i32
    %c0_i32_1 = arith.constant 0 : i32
    return %arg0, %c0_i32, %c0_i32_0 : i32, i32, i32
  }
  func.func @transform_1(%arg0: i32, %arg1: i32) -> (i32, i32, i32) {
    %c0_i32 = arith.constant 0 : i32
    %c0_i32_0 = arith.constant 0 : i32
    %c0_i32_1 = arith.constant 0 : i32
    return %arg0, %c0_i32, %c0_i32_0 : i32, i32, i32
  }
  func.func @transform_2(%arg0: i32, %arg1: i32) -> (i32, i32, i32) {
    %c0_i32 = arith.constant 0 : i32
    %c0_i32_0 = arith.constant 0 : i32
    %c0_i32_1 = arith.constant 0 : i32
    return %arg0, %c0_i32, %c0_i32_0 : i32, i32, i32
  }
  func.func @transform_3(%arg0: i32, %arg1: i32) -> (i32, i32) {
    %c0_i32 = arith.constant 0 : i32
    %c0_i32_0 = arith.constant 0 : i32
    %c0_i32_1 = arith.constant 0 : i32
    return %c0_i32, %c0_i32_0 : i32, i32
  }
  func.func @transform_4(%arg0: i32, %arg1: i32) -> (i32, i32) {
    %c0_i32 = arith.constant 0 : i32
    %c0_i32_0 = arith.constant 0 : i32
    %c0_i32_1 = arith.constant 0 : i32
    return %c0_i32, %c0_i32_0 : i32, i32
  }
  func.func @transform_5(%arg0: i32, %arg1: i32) -> (i32, i32, i32) {
    %c0_i32 = arith.constant 0 : i32
    %c0_i32_0 = arith.constant 0 : i32
    %c0_i32_1 = arith.constant 0 : i32
    return %arg1, %c0_i32, %c0_i32_0 : i32, i32, i32
  }
  func.func @transform_6(%arg0: i32, %arg1: i32) -> (i32, i32, i32) {
    %c0_i32 = arith.constant 0 : i32
    %c0_i32_0 = arith.constant 0 : i32
    %c0_i32_1 = arith.constant 0 : i32
    return %arg1, %c0_i32, %c0_i32_0 : i32, i32, i32
  }
  func.func @transform_7(%arg0: i32, %arg1: i32) -> (i32, i32, i32) {
    %c0_i32 = arith.constant 0 : i32
    %c0_i32_0 = arith.constant 0 : i32
    %c0_i32_1 = arith.constant 0 : i32
    return %arg1, %c0_i32, %c0_i32_0 : i32, i32, i32
  }
  func.func @transform_8(%arg0: i32, %arg1: i32) -> (i32, i32, i32) {
    %c0_i32 = arith.constant 0 : i32
    %c0_i32_0 = arith.constant 0 : i32
    %c0_i32_1 = arith.constant 0 : i32
    return %arg1, %c0_i32, %c0_i32_0 : i32, i32, i32
  }
  func.func @transform_9(%arg0: i32, %arg1: i32) -> (i32, i32, i32) {
    %c0_i32 = arith.constant 0 : i32
    %c0_i32_0 = arith.constant 0 : i32
    %c0_i32_1 = arith.constant 0 : i32
    return %arg1, %c0_i32, %c0_i32_0 : i32, i32, i32
  }
  func.func @transform_10(%arg0: i32, %arg1: i32) -> (i32, i32, i32) {
    %c0_i32 = arith.constant 0 : i32
    %c0_i32_0 = arith.constant 0 : i32
    %c0_i32_1 = arith.constant 0 : i32
    return %arg1, %c0_i32, %c0_i32_0 : i32, i32, i32
  }
  func.func @transform_11(%arg0: i32, %arg1: i32) -> (i32, i32, i32) {
    %c0_i32 = arith.constant 0 : i32
    %c0_i32_0 = arith.constant 0 : i32
    %c0_i32_1 = arith.constant 0 : i32
    return %arg0, %c0_i32, %c0_i32_0 : i32, i32, i32
  }
}

</mosaic_0001>

<bundles_post_ra>
// kernel: tpu_custom_call.1
= control target key start
LH: loop header
LB: loop body
LE: loop exit
PB: predicated region body
PF: predicated region fallthrough
CT: control target
= control target key end

     0   :  { %s3719_s0 = inlined_call_operand.vmem [shape: f32[2,8,1], index: 0, kind: input, shape index: {}]   ;;  %s3720_s1 = inlined_call_operand.vmem [shape: f32[2,1,8], index: 1, kind: input, shape index: {}]   ;;  %s3721_s2 = inlined_call_operand.vmem [shape: f32[2,8,1], index: 2, kind: input, shape index: {}]   ;;  %s3722_s3 = inlined_call_operand.vmem [shape: f32[8,128], index: 3, kind: input, shape index: {}]   ;;  %s3723_s4 = inlined_call_operand.hbm [shape: f32[2,128], index: 4, kind: input, shape index: {}]   ;;  %s3724_s5 = inlined_call_operand.hbm [shape: bf16[2,128,128], index: 5, kind: input, shape index: {}]   ;;  %s3725_s6 = inlined_call_operand.vmem [shape: bf16[2,32,128], index: 6, kind: input, shape index: {}]   ;;  %s3726_s7 = inlined_call_operand.hbm [shape: bf16[2,128,128], index: 7, kind: input, shape index: {}]   ;;  %s3727_s8 = inlined_call_operand.vmem [shape: f32[2,1,128], index: 8, kind: input, shape index: {}]   ;;  %s3728_s9 = inlined_call_operand.hbm [shape: bf16[2,128,128], index: 9, kind: input, shape index: {}]   ;;  %s3729_s10 = inlined_call_operand.vmem [shape: f32[2,8,128], index: 10, kind: input, shape index: {}]   ;;  %s3730_s11 = inlined_call_operand.hbm [shape: f32[2,8,128], index: 11, kind: output, shape index: {}]  }
   0x1   :  { %3748 = sst [smem:[#allocation21_spill]] %s3721_s2 }
   0x2   :  { %3749 = sst [smem:[#allocation22_spill]] %s3722_s3 }
   0x3   :  { %3750 = sst [smem:[#allocation23_spill]] %s3724_s5 }
   0x4   :  { %3751 = sst [smem:[#allocation24_spill]] %s3726_s7 }
   0x5   :  { %3752 = sst [smem:[#allocation25_spill]] %s3730_s11 }
   0x6   :  { %16 = vsyncpa [#allocation5], 0 }
   0x7   :  { %17 = vsyncpa [#allocation8], 0 }
   0x8   :  { %19 = vsyncpa [#allocation8 + $0x1], 0 }
   0x9   :  { %20 = vsyncpa [#allocation11], 0 }
   0xa   :  { %22 = vsyncpa [#allocation11 + $0x1], 0 }
   0xb   :  { %23 = vsyncpa [#allocation6], 0  ;;  %s3126_s17 = smov 0   ;;  %s3128_s18 = smov 0  }
   0xc   :  { %s3130_s19 = smov 0   ;;  %s3132_s20 = smov 0  }
   0xd   :  { %s3134_s21 = smov 0   ;;  %s3136_s22 = smov 0  }
   0xe LB: > { %3753 = sst [smem:[#allocation17_spill]] %s3033_s21  ;;  %s38_s23 = sadd.s32 1, %s3033_s21  ;;  %s3037_s22 = sphi %s3136_s22, %s29_s22   ;;  %s3033_s21 = sphi %s3134_s21, %s3780_s21   ;;  %s3029_s20 = sphi %s3132_s20, %s3779_s20   ;;  %s3025_s19 = sphi %s3130_s19, %s3783_s19   ;;  %s3021_s18 = sphi %s3128_s18, %s3782_s18   ;;  %s3017_s17 = sphi %s3126_s17, %s3781_s17  }
   0xf   : > { %3754 = sst [smem:[#allocation18_spill]] %s3037_s22  ;;  %s168_s24 = sadd.s32 1, %s3025_s19 }
  0x10   : > { %p39_p0 = scmp.ge.s32.totalorder %s38_s23, 2  ;;  %p175_p1 = scmp.ne.s32.totalorder %s3025_s19, %s3021_s18 }
  0x11   : > { %p176_p2 = scmp.eq.s32.totalorder %s3037_s22, 0  ;;  %p2667_p4 = scmp.lt.s32.totalorder %s3037_s22, 2 }
  0x12   : > { %s3785_s23 = smov (%p39_p0, %s38_s23), 0  ;;  %s401_s26 = sand.u32 1, %s3037_s22  }
  0x13   : > { %3755 = sst [smem:[#allocation19_spill]] %s3785_s23  ;;  %p177_p3 = por %p176_p2, %p175_p1 }
  0x14   : > { %s165_s25 = ssub.s32 %s3033_s21, %s3785_s23  ;;  %s3731_s27 = sand.u32 1, %s3025_s19  }
  0x15   : > { %p166_p5 = scmp.eq.s32.totalorder %s165_s25, 0  ;;  %s3169_s28 = sshll.u32 %s3033_s21, 10 }
  0x16   : > { %s3176_s30 = sshll.u32 %s3731_s27, 6  ;;  %s3757_s5 = sld [smem:[#allocation23_spill]] }
  0x17   : > { %s3172_s29 = scalar_select %p166_p5, %s3025_s19, %s168_s24  }
  0x18   : > { %p3184_p6 = pnand %p2667_p4, %p177_p3  ;;  %s405_s16 = scalar_lea.vmem [#allocation7], %s3176_s30 }
  0x19   : > { %3756 = sst [smem:[#allocation20_spill]] %s3172_s29  ;;  %s412_s24 = sshll.u32 %s405_s16, 4  ;;  %s3189_s24 = int_to_ptr.vmem [resolvable:$true] %s412_s24 }
  0x1a   : > { %s3758_s15 = scalar_select %p3184_p6, 1, 0 }
  0x1b   : > { %s3191_s25 = scalar_lea.sflag [#allocation8], %s401_s26  ;;  %p3197_p8 = pneg %p3184_p6 }
  0x1c   : > { %s3182_s14 = scalar_lea.hbm %s3757_s5, %s3169_s28  ;;  %s2836_s21 = scalar_lea.hbm %s3757_s5, 2048 }
  0x1d   : > { %s2831_s27 = scalar_lea.hbm %s3182_s14, 1024  ;;  %p2837_p11 = scmp.lt.u32.totalorder %s3182_s14, %s3757_s5 }
  0x1e   : > { %p2832_p7 = scmp.ne.s32.totalorder %s3182_s14, %s2831_s27  ;;  %p2838_p12 = scmp.lt.u32.totalorder %s2836_s21, %s2831_s27 }
  0x1f   : > { %s3759_s12 = scalar_select %p3197_p8, 1, 0 }
  0x20   : > { %p2834_p9 = pnand %p3197_p8, %p2832_p7  ;;  %p2839_p13 = por %p2838_p12, %p2837_p11 }
  0x21   : > { %p2840_p0 = scmp.lt.u32.totalorder %s2831_s27, %s3182_s14 }
  0x22   : > { %p2835_p10 = pneg %p2834_p9 }
  0x23   : > { %p2841_p1 = por %p2840_p0, %p2839_p13 }
  0x25   : > { %p2842_p2 = pnand %p2841_p1, %p2835_p10 }
  0x27   : > { %2845 = shalt.err (!%p2842_p2)
}
  0x28   : > { %s2846_s26 = scalar_lea.vmem %s3189_s24, 1024  ;;  %s3039_s23 = smov [#allocation7]  }
  0x29   : > { %p2847_p3 = scmp.ne.s32.totalorder %s3189_s24, %s2846_s26  ;;  %s2851_s13 = sshll.u32 %s3039_s23, 4  ;;  %s2852_s13 = int_to_ptr.vmem [resolvable:$false] %s2851_s13 }
  0x2a   : > { %s2853_s29 = scalar_lea.vmem %s2852_s13, 2048  ;;  %p2854_p7 = scmp.lt.s32.totalorder %s3189_s24, %s2852_s13 }
  0x2b   : > { %p2849_p4 = pnand %p2847_p3, %p3197_p8  ;;  %p2855_p9 = scmp.lt.s32.totalorder %s2853_s29, %s2846_s26 }
  0x2d   : > { %p2850_p5 = pneg %p2849_p4  ;;  %p2856_p11 = por %p2855_p9, %p2854_p7 }
  0x2f   : > { %p2857_p12 = pnand %p2856_p11, %p2850_p5 }
  0x31   : > { %2860 = shalt.err (!%p2857_p12)
}
  0x32   : > { %s3734_s21 = smov 64   ;;  %s3736_s27 = smov 4  }
  0x33   : > { %2659 = dma.hbm_to_vmem [thread:$0]  (!%p3184_p6), %s3182_s14, 1024, %s3189_s24, %s3191_s25, %s3734_s21, %s3734_s21, %s3736_s27  }
  0x34   : > { %s3225_s16 = sadd.s32 4294967295, %s3037_s22   ;;  %p181_p10 = scmp.ne.s32.totalorder %s3021_s18, %s3017_s17 }
  0x35   : > { %p3741_p13 = scmp.eq.s32.totalorder %s3225_s16, 0  ;;  %p2334_p0 = scmp.ge.s32.totalorder %s3037_s22, 1 }
  0x36   : > { %p348_p1 = scmp.lt.s32.totalorder %s3037_s22, 3  ;;  %s3042_s14 = smov [#allocation4]  }
  0x37   : > { %p3234_p2 = por %p3741_p13, %p181_p10  ;;  %s390_s24 = sshll.u32 %s3042_s14, 4  ;;  %s3244_s24 = int_to_ptr.vmem [resolvable:$true] %s390_s24 }
  0x38   : > { %p3238_p3 = pnand %p2334_p0, %p348_p1  ;;  %s3762_s7 = sld [smem:[#allocation24_spill]] }
  0x39   : > { %s3760_s26 = scalar_select %p3234_p2, 1, 0 }
  0x3a   : > { %s3761_s23 = scalar_select %p3238_p3, 1, 0 }
  0x3b   : > { %p2652_p4 = pneg %p3238_p3  ;;  %s434_s21 = scalar_lea.vmem [#allocation9], %s3176_s30 }
  0x3c   : > { %s441_s27 = sshll.u32 %s434_s21, 4  ;;  %s3259_s27 = int_to_ptr.vmem [resolvable:$true] %s441_s27 }
  0x3d   : > { %p3255_p5 = pnand %p2652_p4, %p3741_p13 }
  0x3e   : > { %s3250_s29 = scalar_lea.hbm %s3762_s7, %s3169_s28  ;;  %s2866_s22 = scalar_lea.hbm %s3762_s7, 2048 }
  0x3f   : > { %s3763_s5 = scalar_select %p3255_p5, 1, 0 }
  0x40   : > { %s2861_s14 = scalar_lea.hbm %s3250_s29, 1024  ;;  %p2867_p12 = scmp.lt.u32.totalorder %s3250_s29, %s3762_s7 }
  0x41   : > { %p2862_p7 = scmp.ne.s32.totalorder %s3250_s29, %s2861_s14  ;;  %p2868_p10 = scmp.lt.u32.totalorder %s2866_s22, %s2861_s14 }
  0x42   : > { %p2870_p1 = scmp.lt.u32.totalorder %s2861_s14, %s3250_s29 }
  0x43   : > { %p2864_p9 = pnand %p2862_p7, %p3197_p8  ;;  %p2869_p0 = por %p2868_p10, %p2867_p12 }
  0x45   : > { %p2865_p11 = pneg %p2864_p9  ;;  %p2871_p4 = por %p2870_p1, %p2869_p0 }
  0x47   : > { %p2872_p13 = pnand %p2871_p4, %p2865_p11 }
  0x49   : > { %2875 = shalt.err (!%p2872_p13)
}
  0x4a   : > { %s2876_s21 = scalar_lea.vmem %s3259_s27, 1024  ;;  %s3043_s17 = smov [#allocation9]  }
  0x4b   : > { %p2877_p7 = scmp.ne.s32.totalorder %s3259_s27, %s2876_s21  ;;  %s2881_s13 = sshll.u32 %s3043_s17, 4  ;;  %s2882_s13 = int_to_ptr.vmem [resolvable:$false] %s2881_s13 }
  0x4c   : > { %s2883_s2 = scalar_lea.vmem %s2882_s13, 2048  ;;  %p2884_p3 = scmp.lt.s32.totalorder %s3259_s27, %s2882_s13 }
  0x4d   : > { %p2879_p9 = pnand %p2877_p7, %p3197_p8  ;;  %p2885_p5 = scmp.lt.s32.totalorder %s2883_s2, %s2876_s21 }
  0x4f   : > { %p2880_p2 = pneg %p2879_p9  ;;  %p2886_p12 = por %p2885_p5, %p2884_p3 }
  0x51   : > { %p2887_p10 = pnand %p2886_p12, %p2880_p2 }
  0x53   : > { %2890 = shalt.err (!%p2887_p10)
}
  0x54   : > { %s3764_s11 = smov 4   ;;  %s3765_s22 = smov 64  }
  0x55   : > { %2662 = dma.hbm_to_vmem [thread:$0]  (!%p3184_p6), %s3250_s29, 1024, %s3259_s27, %s3191_s25, %s3765_s22, %s3765_s22, %s3764_s11  }
  0x56   : > { %s2891_s17 = scalar_lea.hbm %s3723_s4, 32  ;;  %p3766_p2 = scmp.ne.s32.totalorder %s3763_s5, 0 }
  0x57   : > { %p2892_p13 = scmp.ne.s32.totalorder %s3723_s4, %s2891_s17  ;;  %p2898_p0 = scmp.lt.u32.totalorder %s2891_s17, %s3723_s4 }
  0x58   : > { %p2893_p3 = pneg %p3766_p2 }
  0x5a   : > { %p2894_p5 = pnand %p2893_p3, %p2892_p13 }
  0x5c   : > { %p2895_p11 = pneg %p2894_p5 }
  0x5e   : > { %p2900_p1 = pnand %p2898_p0, %p2895_p11 }
  0x60   : > { %2903 = shalt.err (!%p2900_p1)
}
  0x61   : > { %s2904_s25 = scalar_lea.vmem %s3244_s24, 32  ;;  %p2912_p12 = scmp.lt.s32.totalorder %s3244_s24, %s3244_s24 }
  0x62   : > { %p2905_p4 = scmp.ne.s32.totalorder %s3244_s24, %s2904_s25  ;;  %p2913_p10 = scmp.lt.s32.totalorder %s2904_s25, %s2904_s25 }
  0x64   : > { %p2907_p7 = pnand %p2905_p4, %p2893_p3  ;;  %p2914_p6 = por %p2913_p10, %p2912_p12 }
  0x66   : > { %p2908_p9 = pneg %p2907_p7 }
  0x68   : > { %p2915_p8 = pnand %p2914_p6, %p2908_p9 }
  0x6a   : > { %2918 = shalt.err (!%p2915_p8)
}
  0x6b   : > { %2655 = dma.hbm_to_vmem [thread:$0]  (!%p3766_p2), %s3723_s4, 32, %s3244_s24, [#allocation5]  }
  0x6c   : > { %s3311_s14 = scalar_lea.hbm %s3728_s9, %s3169_s28  ;;  %s461_s17 = scalar_lea.vmem [#allocation10], %s3176_s30 }
  0x6d   : > { %s468_s5 = sshll.u32 %s461_s17, 4  ;;  %s3767_s13 = sand.u32 1, %s3025_s19   ;;  %s3314_s5 = int_to_ptr.vmem [resolvable:$true] %s468_s5 }
  0x6e   : > { %s3318_s21 = scalar_lea.sflag [#allocation11], %s3767_s13  ;;  %s2919_s2 = scalar_lea.hbm %s3311_s14, 1024 }
  0x6f   : > { %p2920_p6 = scmp.ne.s32.totalorder %s3311_s14, %s2919_s2  ;;  %p3768_p8 = scmp.ne.s32.totalorder %s3759_s12, 0 }
  0x70   : > { %s2924_s28 = scalar_lea.hbm %s3728_s9, 2048  ;;  %p2925_p3 = scmp.lt.u32.totalorder %s3311_s14, %s3728_s9 }
  0x71   : > { %p2922_p13 = pnand %p2920_p6, %p3768_p8  ;;  %p2926_p5 = scmp.lt.u32.totalorder %s2924_s28, %s2919_s2 }
  0x72   : > { %p2928_p0 = scmp.lt.u32.totalorder %s2919_s2, %s3311_s14 }
  0x73   : > { %p2923_p2 = pneg %p2922_p13  ;;  %p2927_p11 = por %p2926_p5, %p2925_p3 }
  0x75   : > { %p2929_p1 = por %p2928_p0, %p2927_p11 }
  0x77   : > { %p2930_p4 = pnand %p2929_p1, %p2923_p2 }
  0x79   : > { %2933 = shalt.err (!%p2930_p4)
}
  0x7a   : > { %s2934_s30 = scalar_lea.vmem %s3314_s5, 1024  ;;  %s3044_s27 = smov [#allocation10]  }
  0x7b   : > { %p2935_p7 = scmp.ne.s32.totalorder %s3314_s5, %s2934_s30  ;;  %s2939_s29 = sshll.u32 %s3044_s27, 4  ;;  %s2940_s29 = int_to_ptr.vmem [resolvable:$false] %s2939_s29 }
  0x7c   : > { %s2941_s17 = scalar_lea.vmem %s2940_s29, 2048  ;;  %p2942_p10 = scmp.lt.s32.totalorder %s3314_s5, %s2940_s29 }
  0x7d   : > { %p2937_p9 = pnand %p2935_p7, %p3768_p8  ;;  %p2943_p6 = scmp.lt.s32.totalorder %s2941_s17, %s2934_s30 }
  0x7f   : > { %p2938_p12 = pneg %p2937_p9  ;;  %p2944_p13 = por %p2943_p6, %p2942_p10 }
  0x81   : > { %p2945_p3 = pnand %p2944_p13, %p2938_p12 }
  0x83   : > { %2948 = shalt.err (!%p2945_p3)
}
  0x84   : > { %p3769_p2 = scmp.ne.s32.totalorder %s3758_s15, 0  ;;  %p3770_p8 = scmp.ne.s32.totalorder %s3761_s23, 0 }
  0x85   : > { %p3771_p5 = scmp.eq.s32.totalorder (!%p3770_p8), %s3225_s16, 0 }
  0x86   : > { %2665 = dma.hbm_to_vmem [thread:$0]  (!%p3769_p2), %s3311_s14, 1024, %s3314_s5, %s3318_s21, %s3765_s22, %s3765_s22, %s3764_s11  }
  0x87   : > { %487 = sbr.rel (%p3770_p8) target bundleno = 4532 (0x11b4), region = 64 }
  0x8e   : > { %3000 = dma.done.wait (%p3771_p5), [#allocation5], 32   ;;  %p3772_p11 = pmov %p3771_p5 }
  0x8f   : > { %s493_s15 = sand.u32 1, %s3225_s16   ;;  %s495_s12 = sand.u32 1, %s3021_s18  }
  0x90   : > { %3002 = vsyncadd (%p3772_p11), [#allocation5], 4294967264  ;;  %s2351_s13 = sshll.u32 %s495_s12, 6  ;;  %s494_s2 = scalar_lea.sflag [#allocation8], %s493_s15 }
  0x91   : > { %s3353_s24 = scalar_lea.vmem [#allocation7], %s2351_s13  ;;  %p3773_p0 = scmp.ne.s32.totalorder %s3760_s26, 0 }
  0x93   : > { %3004 = dma.done.wait (%p3773_p0), %s494_s2, 2048  }
  0x94   : > { %3006 = vsyncadd (%p3773_p0), %s494_s2, 4294965248  ;;  %s3359_s23 = scalar_lea.vmem [#allocation9], %s2351_s13  ;;  %s512_s11 = scalar_lea.sflag [#allocation11], %s495_s12 }
  0x95   : > { %s3361_s22 = scalar_lea.vmem [#allocation10], %s2351_s13 }
  0x96   : > { %3008 = dma.done.wait (%p3773_p0), %s512_s11, 1024  }
  0x97   : > { %3010 = vsyncadd (%p3773_p0), %s512_s11, 4294966272  ;;  %p602_p1 = scmp.lt.s32.totalorder %s3029_s20, 1  ;;  %p2357_p4 = scmp.ne.s32.totalorder %s3029_s20, 0 }
  0x98   : > { %v620_v0 = vld [vmem:[%s3719_s0] sm:$0xff] (!%p2357_p4)  ;;  %v633_v1 = vlaneseq (!%p2357_p4)  ;;  %v3045_v2 = vmov (!%p2357_p4), 0   ;;  %v621_v9 = vld [vmem:[%s3719_s0 + $0x8] sm:$0xff] (!%p2357_p4)  ;;  %v3046_v11 = vmov (!%p2357_p4), 0.0   ;;  %vm671_vm1 = vcmask (!%p2357_p4), 64512  }
  0x99   : > { %s3369_s14 = scalar_select %p602_p1, %s3029_s20, 1 }
  0x9a   : > { %619 = sbr.rel (%p2357_p4) target bundleno = 292 (0x124), region = 84  ;;  %2743 = vset.pattern.permute.xlu0 (!%p2357_p4), %v3045_v2  ;;  %v647_v3 = vld [vmem:[%s3720_s1] sm:$0x1] (!%p2357_p4)  ;;  %v648_v4 = vld [vmem:[%s3720_s1 + $0x1] sm:$0x1] (!%p2357_p4)  ;;  %v634_v5 = vshrl.u32 (!%p2357_p4), %v633_v1, 7 }
  0x9b   : > { %s2411_s5 = sshll.u32 %s3369_s14, 4  ;;  %s609_s28 = scalar_lea.vmem %s3727_s8, %s3369_s14  ;;  %625 = vperm.xlu0 (!%p2357_p4), %2743, %v620_v0   ;;  %v649_v6 = vmul.f32 (!%p2357_p4), -1e+09, %v647_v3  ;;  %v650_v7 = vmul.f32 (!%p2357_p4), -1e+09, %v648_v4  ;;  %v654_v8 = vand.u32 (!%p2357_p4), 127, %v633_v1 }
  0x9c   : > { %s3379_s30 = scalar_lea.vmem %s3725_s6, %s2411_s5  ;;  %s2356_s26 = sshll.u32 %s3369_s14, 3  ;;  %v635_v10 = vsub.s32 (!%p2357_p4), 0, %v634_v5  ;;  %v622_v17 = vld [vmem:[#allocation4] sm:$0x3] (!%p2357_p4)  ;;  %v641_v18 = vsub.s32 (!%p2357_p4), 1, %v634_v5 }
  0x9d   : > { %s3385_s17 = scalar_lea.vmem %s3729_s10, %s2356_s26  ;;  %vm655_vm0 = vcmp.gt.s32.totalorder (!%p2357_p4), %v654_v8, %v634_v5 }
  0x9e   : > { %v656_v12 = vsel (!%p2357_p4), %vm655_vm0, -1e+09, %v3046_v11  ;;  %v662_v13 = vrot.slane (!%p2357_p4), %v649_v6, %v635_v10  ;;  %v666_v14 = vrot.slane (!%p2357_p4), %v650_v7, %v635_v10  ;;  %v636_v19 = vrot.slane (!%p2357_p4), %v622_v17, %v635_v10 }
  0x9f   : > { %630 = vperm.xlu0 (!%p2357_p4), %2743, %v621_v9   ;;  %v642_v20 = vrot.slane (!%p2357_p4), %v622_v17, %v641_v18 }
  0xa0   : > { %v669_v15 = vadd.f32 (!%p2357_p4), %v662_v13, %v656_v12  ;;  %v670_v16 = vadd.f32 (!%p2357_p4), %v666_v14, %v656_v12 }
  0xa2   : > { %672 = vst.msk [vmem:[#allocation3] sm:$0xff] %vm671_vm1, %v669_v15  ;;  %673 = vst.msk [vmem:[#allocation3 + $0x8] sm:$0xff] %vm671_vm1, %v670_v16 }
 0x11a   : > { %v626_v21 = vpop.permute.xlu0 %625 }
 0x11b   : > { %v637_v22 = vmul.f32 %v636_v19, %v626_v21 }
 0x11d   : > { %v643_v23 = vadd.f32 %v642_v20, %v637_v22 }
 0x11e   : > { %v631_v24 = vpop.permute.xlu0 %630 }
 0x11f   : > { %645 = vst [vmem:[#allocation2] sm:$0xff] %v643_v23  ;;  %v638_v25 = vmul.f32 %v636_v19, %v631_v24 }
 0x121   : > { %v644_v26 = vadd.f32 %v642_v20, %v638_v25 }
 0x123   : > { %646 = vst [vmem:[#allocation2 + $0x8] sm:$0xff] %v644_v26 }
 0x124 PF: > { %v2761_v27 = vld [vmem:[%s3353_s24] sm:$0xff]   ;;  %v3047_v28 = vmov 0.0   ;;  %v2762_v29 = vld [vmem:[%s3353_s24 + $0x8] sm:$0xff]   ;;  %vm3048_vm2 = vmmov 0   ;;  %v2763_v30 = vld [vmem:[%s3353_s24 + $0x10] sm:$0xff]   ;;  %s3774_s26 = sld [smem:[#allocation22_spill]] }
 0x125   : > { %2474 = vmatprep.subr.bf16.mxu0 %v3047_v28  ;;  %2494 = vmatprep.subr.bf16.mxu1 %v3047_v28  ;;  %v2764_v31 = vld [vmem:[%s3353_s24 + $0x18] sm:$0xff]   ;;  %v2765_v32 = vld [vmem:[%s3353_s24 + $0x20] sm:$0xff]   ;;  %v2766_v33 = vld [vmem:[%s3353_s24 + $0x28] sm:$0xff]   ;;  %s3049_s27 = smov 96   ;;  %vm801_vm3 = vcmask 64512   ;;  %s3051_s29 = smov 88  }
 0x126   : > { %2475 = vmatpush3.bf16.msra.mxu0 %v2761_v27  ;;  %2490 = vmatprep.mubr.msk.bf16.mxu0 %vm3048_vm2, %v3047_v28  ;;  %v2767_v34 = vld [vmem:[%s3353_s24 + $0x30] sm:$0xff]   ;;  %v679_v35 = vld [vmem:[#allocation2] sm:$0xff]  ;;  %vm930_vm4 = vcmask 1043456   ;;  %s3052_s15 = smov 120   ;;  %s3053_s12 = smov 56   ;;  %vm1720_vm5 = vcmask 130048  }
 0x127   : > { %2476 = vmatprep.subr.bf16.mxu0 %v3047_v28  ;;  %2496 = vmatprep.mubr.msk.bf16.mxu1 %vm3048_vm2, %v3047_v28  ;;  %v2768_v40 = vld [vmem:[%s3353_s24 + $0x38] sm:$0xff]   ;;  %v3451_v53 = vld [vmem:[#allocation3] sm:$0xff]  ;;  %s3050_s24 = smov 64   ;;  %s3054_s13 = smov 112   ;;  %vm1723_vm6 = vcmask 195584   ;;  %vm1747_vm7 = vcmask 261120  }
 0x128   : > { %v3455_v61 = vld [vmem:[#allocation3 + $0x8] sm:$0xff]  ;;  %s3055_s2 = smov 80   ;;  %s3056_s11 = smov 48  }
 0x129   : > { %s3057_s5 = smov 72   ;;  %s3058_s21 = smov 104  }
 0x12a   : > { %2477 = vmatpush3.bf16.msra.mxu0 %v2762_v29  ;;  %v680_v36 = vld [vmem:[#allocation2 + $0x8] sm:$0xff]  ;;  %v681_v37 = vld [vmem:[%s3774_s26] sm:$0xff]  ;;  %s3059_s25 = smov 40   ;;  %s3060_s3 = smov 8  }
 0x12b   : > { %2478 = vmatprep.subr.bf16.mxu0 %v3047_v28  ;;  %v3422_v38 = vadd.f32 %v681_v37, %v679_v35  ;;  %v3424_v39 = vadd.f32 %v681_v37, %v680_v36  ;;  %s3061_s7 = smov 16   ;;  %s3062_s26 = smov 24  }
 0x12c   : > { %p2403_p7 = scmp.ne.s32.totalorder %s3029_s20, 1 }
 0x12d   : > { %v684_v41 = vpack.c.bf16 %v3424_v39, %v3422_v38 }
 0x12e   : > { %2479 = vmatpush3.bf16.msra.mxu0 %v2763_v30 }
 0x12f   : > { %2480 = vmatprep.subr.bf16.mxu0 %v3047_v28 }
 0x132   : > { %2481 = vmatpush3.bf16.msra.mxu0 %v2764_v31 }
 0x133   : > { %2482 = vmatprep.subr.bf16.mxu0 %v3047_v28 }
 0x136   : > { %2483 = vmatpush3.bf16.msra.mxu0 %v2765_v32 }
 0x137   : > { %2484 = vmatprep.subr.bf16.mxu0 %v3047_v28 }
 0x13a   : > { %2485 = vmatpush3.bf16.msra.mxu0 %v2766_v33 }
 0x13b   : > { %2486 = vmatprep.subr.bf16.mxu0 %v3047_v28 }
 0x13e   : > { %2487 = vmatpush3.bf16.msra.mxu0 %v2767_v34 }
 0x13f   : > { %2488 = vmatprep.subr.bf16.mxu0 %v3047_v28 }
 0x142   : > { %2489 = vmatpush3.bf16.msra.mxu0 %v2768_v40 }
 0x143   : > { %2518 = vmatprep.subr.bf16.mxu0 %v3047_v28 }
 0x145   : > { %2491 = vmatmul.mubr.bf16.vlgmr.msra.gmra.mrb[0].mxu0 %v684_v41 }
 0x146   : > { %2520 = vmatprep.mubr.msk.bf16.mxu0 %vm3048_vm2, %v3047_v28 }
 0x218   : > { %v789_v42 = vpop.f32.mrb[0].mxu0 }
 0x219   : > { %v3433_v43 = vpack.c.bf16 %v789_v42, %v789_v42  ;;  %v2492_v44 = vpop.f32.mrb[1].mxu0 }
 0x21a   : > { %v792_v45 = vpop.f32.mrb[2].mxu0 }
 0x21b   : > { %799 = vrot.lane.b32.xlu0 %v3433_v43, %s3049_s27  ;;  %v2493_v46 = vpop.f32.mrb[3].mxu0  ;;  %v3436_v47 = vpack.c.bf16 %v792_v45, %v792_v45 }
 0x21f   : > { %849 = vrot.lane.b32.xlu0 %v3436_v47, %s3049_s27  ;;  %s3775_s27 = sld [smem:[#allocation21_spill]] }
 0x28d   : > { %v800_v48 = vpop.permute.xlu0 %799 }
 0x28e   : > { %v806_v49 = vsel %vm801_vm3, %v800_v48, 0 }
 0x28f   : > { %2495 = vmatpush3.bf16.xpose.msra.mxu1 %v806_v49 }
 0x290   : > { %2500 = vmatprep.subr.bf16.mxu1 %v3047_v28 }
 0x291   : > { %v850_v50 = vpop.permute.xlu0 %849 }
 0x292   : > { %v855_v51 = vsel %vm801_vm3, %v850_v50, 0 }
 0x296   : > { %2497 = vmatmul.mubr.msk.bf16.vlgmr.msra.gmra.mrb[0].mxu1 %vm801_vm3, %v3433_v43 }
 0x297   : > { %2501 = vmatpush3.bf16.xpose.msra.mxu1 %v855_v51  ;;  %2502 = vmatprep.mubr.msk.bf16.mxu1 %vm3048_vm2, %v3047_v28 }
 0x298   : > { %2506 = vmatprep.subr.bf16.mxu1 %v3047_v28 }
 0x29e   : > { %2503 = vmatmul.mubr.msk.bf16.vlgmr.msra.gmra.mrb[4].mxu1 %vm801_vm3, %v3436_v47 }
 0x29f   : > { %2508 = vmatprep.mubr.msk.bf16.mxu1 %vm3048_vm2, %v3047_v28 }
 0x369   : > { %v842_v52 = vpop.f32.mrb[0].mxu1 }
 0x36a   : > { %v897_v54 = vmul.f32 0.35355338, %v842_v52  ;;  %v2498_v55 = vpop.f32.mrb[1].mxu1 }
 0x36b   : > { %v845_v56 = vpop.f32.mrb[2].mxu1 }
 0x36c   : > { %v2499_v57 = vpop.f32.mrb[3].mxu1  ;;  %v899_v58 = vadd.f32 %v897_v54, %v3451_v53 }
 0x36e   : > { %v901_v59 = vsel %vm801_vm3, %v899_v58, -inf }
 0x36f   : > { %902 = vmax.xlane.f32.xlu1 %v901_v59 }
 0x371   : > { %v891_v60 = vpop.f32.mrb[4].mxu1 }
 0x372   : > { %v898_v62 = vmul.f32 0.35355338, %v891_v60  ;;  %v2504_v63 = vpop.f32.mrb[5].mxu1 }
 0x373   : > { %v894_v0 = vpop.f32.mrb[6].mxu1 }
 0x374   : > { %v2505_v1 = vpop.f32.mrb[7].mxu1  ;;  %v900_v2 = vadd.f32 %v898_v62, %v3455_v61 }
 0x376   : > { %v904_v3 = vsel %vm801_vm3, %v900_v2, -inf }
 0x377   : > { %905 = vmax.xlane.f32.xlu1 %v904_v3 }
 0x388   : > { %925 = vrot.lane.b32.xlu1 %v3433_v43, %s3050_s24 }
 0x38c   : > { %974 = vrot.lane.b32.xlu1 %v3436_v47, %s3050_s24 }
 0x390   : > { %1024 = vrot.lane.b32.xlu1 %v3433_v43, %s3051_s29 }
 0x3fc   : > { %v903_v4 = vpop.xlane.xlu1 %902 }
 0x3fd   : > { %v907_v5 = vsub.f32 %v899_v58, %v903_v4 }
 0x3ff   : > { %v909_v6 = vmul.f32 1.442695, %v907_v5 }
 0x401   : > { %2787 = vpow2.f32 %v909_v6 }
 0x404   : > { %v906_v7 = vpop.xlane.xlu1 %905 }
 0x405   : > { %v908_v8 = vsub.f32 %v900_v2, %v906_v7 }
 0x407   : > { %v911_v9 = vmul.f32 1.442695, %v908_v8 }
 0x408   : > { %v926_v10 = vpop.permute.xlu1 %925 }
 0x409   : > { %2789 = vpow2.f32 %v911_v9  ;;  %v932_v11 = vsel %vm930_vm4, %v926_v10, 0 }
 0x40a   : > { %2507 = vmatpush3.bf16.msra.mxu1 %v932_v11 }
 0x40b   : > { %v2788_v12 = vpop.eup %2787  ;;  %2512 = vmatprep.subr.bf16.mxu1 %v3047_v28 }
 0x40c   : > { %v975_v13 = vpop.permute.xlu1 %974  ;;  %v913_v14 = vsel %vm801_vm3, %v2788_v12, 0.0 }
 0x40d   : > { %914 = vadd.xlane.f32.xlu0 %v913_v14  ;;  %v980_v25 = vsel %vm930_vm4, %v975_v13, 0 }
 0x410   : > { %v1025_v15 = vpop.permute.xlu1 %1024 }
 0x411   : > { %v1030_v16 = vsel %vm801_vm3, %v1025_v15, 0 }
 0x412   : > { %2519 = vmatpush3.bf16.xpose.msra.mxu0 %v1030_v16 }
 0x413   : > { %v2790_v17 = vpop.eup %2789  ;;  %2530 = vmatprep.subr.bf16.mxu0 %v3047_v28 }
 0x414   : > { %v916_v18 = vsel %vm801_vm3, %v2790_v17, 0.0 }
 0x415   : > { %917 = vadd.xlane.f32.xlu1 %v916_v18 }
 0x423   : > { %1022 = vrot.lane.b32.xlu0 %v3433_v43, %s3052_s15 }
 0x426   : > { %1074 = vrot.lane.b32.xlu1 %v3436_v47, %s3051_s29 }
 0x42a   : > { %1072 = vrot.lane.b32.xlu1 %v3436_v47, %s3052_s15 }
 0x49a   : > { %v915_v19 = vpop.xlane.xlu0 %914 }
 0x49b   : > { %2791 = vrcp.f32 %v915_v19 }
 0x49e   : > { %v1023_v20 = vpop.permute.xlu0 %1022 }
 0x49f   : > { %2521 = vmatmul.mubr.msk.bf16.vlgmr.msra.gmra.mrb[4].mxu0 %vm801_vm3, %v1023_v20 }
 0x4a0   : > { %2532 = vmatprep.mubr.msk.bf16.mxu0 %vm3048_vm2, %v3047_v28 }
 0x4a2   : > { %v918_v21 = vpop.xlane.xlu1 %917 }
 0x4a3   : > { %2793 = vrcp.f32 %v918_v21 }
 0x4a5   : > { %v2792_v22 = vpop.eup %2791 }
 0x4a6   : > { %v921_v23 = vmul.f32 %v2792_v22, %v2788_v12  ;;  %v1075_v29 = vpop.permute.xlu1 %1074 }
 0x4a7   : > { %v1080_v31 = vsel %vm801_vm3, %v1075_v29, 0 }
 0x4a8   : > { %v923_v24 = vpack.c.bf16 %v921_v23, %v921_v23 }
 0x4aa   : > { %2509 = vmatmul.mubr.msk.bf16.vlgmr.msra.gmra.mrb[8].mxu1 %vm801_vm3, %v923_v24  ;;  %v1073_v32 = vpop.permute.xlu1 %1072 }
 0x4ab   : > { %2513 = vmatpush3.bf16.msra.mxu1 %v980_v25  ;;  %2514 = vmatprep.mubr.msk.bf16.mxu1 %vm3048_vm2, %v3047_v28 }
 0x4ac   : > { %2524 = vmatprep.subr.bf16.mxu1 %v3047_v28 }
 0x4ad   : > { %v2794_v26 = vpop.eup %2793 }
 0x4ae   : > { %v922_v27 = vmul.f32 %v2794_v26, %v2790_v17 }
 0x4b0   : > { %v924_v30 = vpack.c.bf16 %v922_v27, %v922_v27 }
 0x4b2   : > { %2515 = vmatmul.mubr.msk.bf16.vlgmr.msra.gmra.mrb[12].mxu1 %vm801_vm3, %v924_v30 }
 0x4b3   : > { %2526 = vmatprep.mubr.msk.bf16.mxu1 %vm3048_vm2, %v3047_v28 }
 0x4b4   : > { %2525 = vmatpush3.bf16.xpose.msra.mxu1 %v1080_v31 }
 0x4b5   : > { %2536 = vmatprep.subr.bf16.mxu1 %v3047_v28 }
 0x4bb   : > { %2527 = vmatmul.mubr.msk.bf16.vlgmr.msra.gmra.mrb[16].mxu1 %vm801_vm3, %v1073_v32 }
 0x4bc   : > { %2538 = vmatprep.mubr.msk.bf16.mxu1 %vm3048_vm2, %v3047_v28 }
 0x572   : > { %v1066_v33 = vpop.f32.mrb[4].mxu0 }
 0x573   : > { %v1122_v34 = vmul.f32 0.35355338, %v1066_v33  ;;  %v2522_v35 = vpop.f32.mrb[5].mxu0 }
 0x574   : > { %v1069_v36 = vpop.f32.mrb[6].mxu0 }
 0x575   : > { %v2523_v37 = vpop.f32.mrb[7].mxu0  ;;  %v1124_v40 = vadd.f32 %v1122_v34, %v3451_v53 }
 0x577   : > { %v1126_v41 = vsel %vm801_vm3, %v1124_v40, -inf }
 0x578   : > { %1127 = vmax.xlane.f32.xlu1 %v1126_v41 }
 0x57d   : > { %v3489_v42 = vpop.f32.mrb[8].mxu1 }
 0x57e   : > { %v2510_v44 = vpop.f32.mrb[9].mxu1 }
 0x57f   : > { %v971_v45 = vpop.f32.mrb[10].mxu1 }
 0x580   : > { %v2511_v46 = vpop.f32.mrb[11].mxu1 }
 0x585   : > { %v3491_v48 = vpop.f32.mrb[12].mxu1 }
 0x586   : > { %v2516_v49 = vpop.f32.mrb[13].mxu1 }
 0x587   : > { %v1019_v50 = vpop.f32.mrb[14].mxu1 }
 0x588   : > { %v2517_v51 = vpop.f32.mrb[15].mxu1 }
 0x58e   : > { %v1116_v52 = vpop.f32.mrb[16].mxu1 }
 0x58f   : > { %v1123_v54 = vmul.f32 0.35355338, %v1116_v52  ;;  %v2528_v55 = vpop.f32.mrb[17].mxu1 }
 0x590   : > { %v1119_v56 = vpop.f32.mrb[18].mxu1 }
 0x591   : > { %v2529_v57 = vpop.f32.mrb[19].mxu1  ;;  %v1125_v58 = vadd.f32 %v1123_v54, %v3455_v61 }
 0x593   : > { %v1129_v59 = vsel %vm801_vm3, %v1125_v58, -inf }
 0x594   : > { %1130 = vmax.xlane.f32.xlu0 %v1129_v59 }
 0x5aa   : > { %1198 = vrot.lane.b32.xlu0 %v3436_v47, %s3053_s12 }
 0x5ae   : > { %1246 = vrot.lane.b32.xlu0 %v3433_v43, %s3054_s13 }
 0x605   : > { %v1128_v60 = vpop.xlane.xlu1 %1127 }
 0x606   : > { %v1132_v62 = vsub.f32 %v1124_v40, %v1128_v60 }
 0x608   : > { %v1134_v63 = vmul.f32 1.442695, %v1132_v62 }
 0x60a   : > { %2795 = vpow2.f32 %v1134_v63 }
 0x614   : > { %v2796_v0 = vpop.eup %2795 }
 0x615   : > { %v1138_v1 = vsel %vm801_vm3, %v2796_v0, 0.0 }
 0x616   : > { %1139 = vadd.xlane.f32.xlu1 %v1138_v1 }
 0x621   : > { %v1131_v2 = vpop.xlane.xlu0 %1130 }
 0x622   : > { %v1133_v5 = vsub.f32 %v1125_v58, %v1131_v2 }
 0x624   : > { %v1136_v6 = vmul.f32 1.442695, %v1133_v5 }
 0x625   : > { %v1199_v3 = vpop.permute.xlu0 %1198 }
 0x626   : > { %v1204_v4 = vsel %vm930_vm4, %v1199_v3, 0  ;;  %2797 = vpow2.f32 %v1136_v6 }
 0x627   : > { %2537 = vmatpush3.bf16.msra.mxu1 %v1204_v4  ;;  %1150 = vrot.lane.b32.xlu1 %v3433_v43, %s3053_s12 }
 0x628   : > { %2548 = vmatprep.subr.bf16.mxu1 %v3047_v28 }
 0x629   : > { %v1247_v17 = vpop.permute.xlu0 %1246 }
 0x62b   : > { %1248 = vrot.lane.b32.xlu1 %v3433_v43, %s3055_s2 }
 0x630   : > { %v2798_v7 = vpop.eup %2797 }
 0x631   : > { %v1141_v8 = vsel %vm801_vm3, %v2798_v7, 0.0 }
 0x64f   : > { %1142 = vadd.xlane.f32.xlu1 %v1141_v8 }
 0x660   : > { %1298 = vrot.lane.b32.xlu1 %v3436_v47, %s3055_s2 }
 0x664   : > { %1296 = vrot.lane.b32.xlu1 %v3436_v47, %s3054_s13 }
 0x6a3   : > { %v1140_v9 = vpop.xlane.xlu1 %1139 }
 0x6a4   : > { %2799 = vrcp.f32 %v1140_v9 }
 0x6a7   : > { %v1151_v10 = vpop.permute.xlu1 %1150 }
 0x6a8   : > { %v1156_v11 = vsel %vm930_vm4, %v1151_v10, 0 }
 0x6a9   : > { %2531 = vmatpush3.bf16.msra.mxu0 %v1156_v11 }
 0x6aa   : > { %2542 = vmatprep.subr.bf16.mxu0 %v3047_v28 }
 0x6ab   : > { %v1249_v14 = vpop.permute.xlu1 %1248 }
 0x6ac   : > { %v1254_v16 = vsel %vm801_vm3, %v1249_v14, 0 }
 0x6ae   : > { %v2800_v12 = vpop.eup %2799 }
 0x6af   : > { %v1146_v13 = vmul.f32 %v2800_v12, %v2796_v0 }
 0x6b1   : > { %v1148_v15 = vpack.c.bf16 %v1146_v13, %v1146_v13 }
 0x6b3   : > { %2533 = vmatmul.mubr.msk.bf16.vlgmr.msra.gmra.mrb[8].mxu0 %vm801_vm3, %v1148_v15 }
 0x6b4   : > { %2543 = vmatpush3.bf16.xpose.msra.mxu0 %v1254_v16  ;;  %2544 = vmatprep.mubr.msk.bf16.mxu0 %vm3048_vm2, %v3047_v28 }
 0x6b5   : > { %2554 = vmatprep.subr.bf16.mxu0 %v3047_v28 }
 0x6bb   : > { %2545 = vmatmul.mubr.msk.bf16.vlgmr.msra.gmra.mrb[12].mxu0 %vm801_vm3, %v1247_v17 }
 0x6bc   : > { %2556 = vmatprep.mubr.msk.bf16.mxu0 %vm3048_vm2, %v3047_v28 }
 0x6dc   : > { %v1143_v18 = vpop.xlane.xlu1 %1142 }
 0x6dd   : > { %2801 = vrcp.f32 %v1143_v18 }
 0x6e0   : > { %v1299_v21 = vpop.permute.xlu1 %1298 }
 0x6e1   : > { %v1304_v23 = vsel %vm801_vm3, %v1299_v21, 0 }
 0x6e4   : > { %v1297_v24 = vpop.permute.xlu1 %1296 }
 0x6e7   : > { %v2802_v19 = vpop.eup %2801 }
 0x6e8   : > { %v1147_v20 = vmul.f32 %v2802_v19, %v2798_v7 }
 0x6ea   : > { %v1149_v22 = vpack.c.bf16 %v1147_v20, %v1147_v20 }
 0x6ec   : > { %2539 = vmatmul.mubr.msk.bf16.vlgmr.msra.gmra.mrb[20].mxu1 %vm801_vm3, %v1149_v22 }
 0x6ed   : > { %2549 = vmatpush3.bf16.xpose.msra.mxu1 %v1304_v23  ;;  %2550 = vmatprep.mubr.msk.bf16.mxu1 %vm3048_vm2, %v3047_v28 }
 0x6ee   : > { %2560 = vmatprep.subr.bf16.mxu1 %v3047_v28 }
 0x6f4   : > { %2551 = vmatmul.mubr.msk.bf16.vlgmr.msra.gmra.mrb[24].mxu1 %vm801_vm3, %v1297_v24 }
 0x6f5   : > { %2562 = vmatprep.mubr.msk.bf16.mxu1 %vm3048_vm2, %v3047_v28 }
 0x786   : > { %v3523_v25 = vpop.f32.mrb[8].mxu0 }
 0x787   : > { %v2534_v26 = vpop.f32.mrb[9].mxu0 }
 0x788   : > { %v1195_v27 = vpop.f32.mrb[10].mxu0 }
 0x789   : > { %v2535_v29 = vpop.f32.mrb[11].mxu0 }
 0x78e   : > { %v1290_v30 = vpop.f32.mrb[12].mxu0 }
 0x78f   : > { %v1346_v31 = vmul.f32 0.35355338, %v1290_v30  ;;  %v2546_v32 = vpop.f32.mrb[13].mxu0 }
 0x790   : > { %v1293_v33 = vpop.f32.mrb[14].mxu0 }
 0x791   : > { %v2547_v34 = vpop.f32.mrb[15].mxu0  ;;  %v1348_v35 = vadd.f32 %v1346_v31, %v3451_v53 }
 0x793   : > { %v1350_v36 = vsel %vm801_vm3, %v1348_v35, -inf }
 0x794   : > { %1351 = vmax.xlane.f32.xlu0 %v1350_v36 }
 0x7bf   : > { %v3527_v37 = vpop.f32.mrb[20].mxu1 }
 0x7c0   : > { %v2744_v40 = vpack.i.bf16 %v3527_v37, %v3523_v25  ;;  %v2540_v41 = vpop.f32.mrb[21].mxu1 }
 0x7c1   : > { %v1243_v44 = vpop.f32.mrb[22].mxu1 }
 0x7c2   : > { %v2541_v45 = vpop.f32.mrb[23].mxu1 }
 0x7c7   : > { %v1340_v46 = vpop.f32.mrb[24].mxu1 }
 0x7c8   : > { %v1347_v49 = vmul.f32 0.35355338, %v1340_v46  ;;  %v2552_v50 = vpop.f32.mrb[25].mxu1 }
 0x7c9   : > { %v1343_v51 = vpop.f32.mrb[26].mxu1 }
 0x7ca   : > { %v2553_v52 = vpop.f32.mrb[27].mxu1  ;;  %v1349_v54 = vadd.f32 %v1347_v49, %v3455_v61 }
 0x7cc   : > { %v1353_v55 = vsel %vm801_vm3, %v1349_v54, -inf }
 0x7cd   : > { %1354 = vmax.xlane.f32.xlu1 %v1353_v55 }
 0x7de   : > { %1374 = vrot.lane.b32.xlu1 %v3433_v43, %s3056_s11 }
 0x7e2   : > { %1472 = vrot.lane.b32.xlu1 %v3433_v43, %s3057_s5 }
 0x7e6   : > { %1522 = vrot.lane.b32.xlu1 %v3436_v47, %s3057_s5 }
 0x7ea   : > { %1520 = vrot.lane.b32.xlu1 %v3436_v47, %s3058_s21 }
 0x821   : > { %v1352_v56 = vpop.xlane.xlu0 %1351 }
 0x822   : > { %v1356_v57 = vsub.f32 %v1348_v35, %v1352_v56 }
 0x824   : > { %v1358_v58 = vmul.f32 1.442695, %v1356_v57 }
 0x826   : > { %2803 = vpow2.f32 %v1358_v58 }
 0x830   : > { %v2804_v59 = vpop.eup %2803 }
 0x831   : > { %v1362_v60 = vsel %vm801_vm3, %v2804_v59, 0.0 }
 0x832   : > { %1363 = vadd.xlane.f32.xlu0 %v1362_v60 }
 0x85a   : > { %v1355_v62 = vpop.xlane.xlu1 %1354 }
 0x85b   : > { %v1357_v63 = vsub.f32 %v1349_v54, %v1355_v62 }
 0x85d   : > { %v1360_v0 = vmul.f32 1.442695, %v1357_v63 }
 0x85e   : > { %v1375_v1 = vpop.permute.xlu1 %1374 }
 0x85f   : > { %2805 = vpow2.f32 %v1360_v0  ;;  %v1380_v2 = vsel %vm930_vm4, %v1375_v1, 0 }
 0x860   : > { %2555 = vmatpush3.bf16.msra.mxu0 %v1380_v2 }
 0x861   : > { %2566 = vmatprep.subr.bf16.mxu0 %v3047_v28 }
 0x862   : > { %v1473_v8 = vpop.permute.xlu1 %1472 }
 0x863   : > { %v1478_v10 = vsel %vm801_vm3, %v1473_v8, 0 }
 0x866   : > { %v1523_v17 = vpop.permute.xlu1 %1522 }
 0x867   : > { %v1528_v19 = vsel %vm801_vm3, %v1523_v17, 0 }
 0x869   : > { %v2806_v3 = vpop.eup %2805 }
 0x86a   : > { %v1365_v4 = vsel %vm801_vm3, %v2806_v3, 0.0  ;;  %v1521_v20 = vpop.permute.xlu1 %1520 }
 0x86b   : > { %1366 = vadd.xlane.f32.xlu0 %v1365_v4 }
 0x881   : > { %1422 = vrot.lane.b32.xlu0 %v3436_v47, %s3056_s11 }
 0x885   : > { %1470 = vrot.lane.b32.xlu0 %v3433_v43, %s3058_s21 }
 0x8bf   : > { %v1364_v5 = vpop.xlane.xlu0 %1363 }
 0x8c0   : > { %2807 = vrcp.f32 %v1364_v5 }
 0x8ca   : > { %v2808_v6 = vpop.eup %2807 }
 0x8cb   : > { %v1370_v7 = vmul.f32 %v2808_v6, %v2804_v59 }
 0x8cd   : > { %v1372_v9 = vpack.c.bf16 %v1370_v7, %v1370_v7  ;;  %v2769_v7 = vld [vmem:[%s3379_s30] sm:$0xff]  }
 0x8cf   : > { %2557 = vmatmul.mubr.msk.bf16.vlgmr.msra.gmra.mrb[16].mxu0 %vm801_vm3, %v1372_v9 }
 0x8d0   : > { %2567 = vmatpush3.bf16.xpose.msra.mxu0 %v1478_v10  ;;  %2568 = vmatprep.mubr.msk.bf16.mxu0 %vm3048_vm2, %v3047_v28 }
 0x8d1   : > { %2578 = vmatprep.subr.bf16.mxu0 %v3047_v28 }
 0x8f8   : > { %v1367_v11 = vpop.xlane.xlu0 %1366 }
 0x8f9   : > { %2809 = vrcp.f32 %v1367_v11 }
 0x8fc   : > { %v1423_v12 = vpop.permute.xlu0 %1422 }
 0x8fd   : > { %v1428_v13 = vsel %vm930_vm4, %v1423_v12, 0  ;;  %v2770_v12 = vld [vmem:[%s3379_s30 + $0x8] sm:$0xff]  }
 0x8fe   : > { %2561 = vmatpush3.bf16.msra.mxu1 %v1428_v13 }
 0x8ff   : > { %2572 = vmatprep.subr.bf16.mxu1 %v3047_v28 }
 0x900   : > { %v1471_v14 = vpop.permute.xlu0 %1470 }
 0x901   : > { %2569 = vmatmul.mubr.msk.bf16.vlgmr.msra.gmra.mrb[20].mxu0 %vm801_vm3, %v1471_v14 }
 0x902   : > { %2580 = vmatprep.mubr.msk.bf16.mxu0 %vm3048_vm2, %v3047_v28 }
 0x903   : > { %v2810_v15 = vpop.eup %2809 }
 0x904   : > { %v1371_v16 = vmul.f32 %v2810_v15, %v2806_v3 }
 0x906   : > { %v1373_v18 = vpack.c.bf16 %v1371_v16, %v1371_v16 }
 0x908   : > { %2563 = vmatmul.mubr.msk.bf16.vlgmr.msra.gmra.mrb[28].mxu1 %vm801_vm3, %v1373_v18 }
 0x909   : > { %2573 = vmatpush3.bf16.xpose.msra.mxu1 %v1528_v19  ;;  %2574 = vmatprep.mubr.msk.bf16.mxu1 %vm3048_vm2, %v3047_v28 }
 0x90a   : > { %2584 = vmatprep.subr.bf16.mxu1 %v3047_v28 }
 0x910   : > { %2575 = vmatmul.mubr.msk.bf16.vlgmr.msra.gmra.mrb[32].mxu1 %vm801_vm3, %v1521_v20 }
 0x911   : > { %2586 = vmatprep.mubr.msk.bf16.mxu1 %vm3048_vm2, %v3047_v28 }
 0x9a2   : > { %v1416_v21 = vpop.f32.mrb[16].mxu0 }
 0x9a3   : > { %v2558_v22 = vpop.f32.mrb[17].mxu0 }
 0x9a4   : > { %v1419_v23 = vpop.f32.mrb[18].mxu0 }
 0x9a5   : > { %v2559_v24 = vpop.f32.mrb[19].mxu0 }
 0x9d4   : > { %v1514_v26 = vpop.f32.mrb[20].mxu0 }
 0x9d5   : > { %v1570_v27 = vmul.f32 0.35355338, %v1514_v26  ;;  %v2570_v29 = vpop.f32.mrb[21].mxu0 }
 0x9d6   : > { %v1517_v30 = vpop.f32.mrb[22].mxu0 }
 0x9d7   : > { %v2571_v31 = vpop.f32.mrb[23].mxu0  ;;  %v1572_v32 = vadd.f32 %v1570_v27, %v3451_v53 }
 0x9d9   : > { %v1574_v33 = vsel %vm801_vm3, %v1572_v32, -inf }
 0x9da   : > { %1575 = vmax.xlane.f32.xlu0 %v1574_v33 }
 0x9db   : > { %v1464_v34 = vpop.f32.mrb[28].mxu1 }
 0x9dc   : > { %v2749_v35 = vpack.i.bf16 %v1464_v34, %v1416_v21  ;;  %v2564_v36 = vpop.f32.mrb[29].mxu1 }
 0x9dd   : > { %v1467_v41 = vpop.f32.mrb[30].mxu1  ;;  %v674_v36 = vlaneseq }
 0x9de   : > { %v2565_v44 = vpop.f32.mrb[31].mxu1 }
 0x9df   : > { %v3593_v41 = vshrl.u32 %v674_v36, 7  ;;  %v3597_v44 = vld [vmem:[%s3385_s17] sm:$0xff] }
 0x9e3   : > { %v1564_v45 = vpop.f32.mrb[32].mxu1 }
 0x9e4   : > { %v1571_v46 = vmul.f32 0.35355338, %v1564_v45  ;;  %v2576_v49 = vpop.f32.mrb[33].mxu1 }
 0x9e5   : > { %v1567_v50 = vpop.f32.mrb[34].mxu1 }
 0x9e6   : > { %v2577_v51 = vpop.f32.mrb[35].mxu1  ;;  %v1573_v52 = vadd.f32 %v1571_v46, %v3455_v61 }
 0x9e8   : > { %v1577_v54 = vsel %vm801_vm3, %v1573_v52, -inf }
 0x9e9   : > { %1578 = vmax.xlane.f32.xlu1 %v1577_v54 }
 0x9fa   : > { %1598 = vrot.lane.b32.xlu1 %v3433_v43, %s3059_s25 }
 0x9fe   : > { %2745 = vrot.lane.b32.xlu1 %v2744_v40, %s3060_s3 }
 0xa02   : > { %2750 = vrot.lane.b32.xlu1 %v2749_v35, %s3061_s7 }
 0xa67   : > { %v1576_v53 = vpop.xlane.xlu0 %1575 }
 0xa68   : > { %v1580_v55 = vsub.f32 %v1572_v32, %v1576_v53 }
 0xa6a   : > { %v1582_v56 = vmul.f32 1.442695, %v1580_v55  ;;  %v3063_v55 = vmov 0  }
 0xa6b   : > { %2759 = vset.pattern.permute.xlu0 %v3063_v55  ;;  %2760 = vset.pattern.permute.xlu1 %v3063_v55 }
 0xa6c   : > { %2811 = vpow2.f32 %v1582_v56  ;;  %v2771_v56 = vld [vmem:[%s3359_s23] sm:$0xff]  }
 0xa76   : > { %v2812_v57 = vpop.eup %2811  ;;  %v1579_v61 = vpop.xlane.xlu1 %1578 }
 0xa77   : > { %v1581_v58 = vsub.f32 %v1573_v52, %v1579_v61  ;;  %v1586_v59 = vsel %vm801_vm3, %v2812_v57, 0.0 }
 0xa78   : > { %1587 = vadd.xlane.f32.xlu0 %v1586_v59 }
 0xa79   : > { %v1584_v60 = vmul.f32 1.442695, %v1581_v58 }
 0xa7a   : > { %v1599_v43 = vpop.permute.xlu1 %1598 }
 0xa7b   : > { %2813 = vpow2.f32 %v1584_v60  ;;  %v1604_v62 = vsel %vm930_vm4, %v1599_v43, 0 }
 0xa7c   : > { %2579 = vmatpush3.bf16.msra.mxu0 %v1604_v62 }
 0xa7d   : > { %2590 = vmatprep.subr.bf16.mxu0 %v3047_v28 }
 0xa7e   : > { %v2746_v18 = vpop.permute.xlu1 %2745 }
 0xa7f   : > { %v2748_v20 = vunpack.i.h.bf16 %v2746_v18  ;;  %v2747_v21 = vunpack.i.l.bf16 %v2746_v18 }
 0xa81   : > { %v1719_v26 = vsel %vm801_vm3, %v3491_v48, %v2748_v20  ;;  %v1718_v27 = vsel %vm801_vm3, %v3489_v42, %v2747_v21  ;;  %v1733_v48 = vsub.s32 0, %v3593_v41 }
 0xa82   : > { %v2751_v19 = vpop.permute.xlu1 %2750 }
 0xa83   : > { %v2753_v22 = vunpack.i.h.bf16 %v2751_v19  ;;  %v2752_v23 = vunpack.i.l.bf16 %v2751_v19  ;;  %v1734_v42 = vrot.slane %v3597_v44, %v1733_v48  ;;  %v2784_v48 = vld [vmem:[%s3361_s22 + $0x28] sm:$0xff]  }
 0xa85   : > { %v2814_v25 = vpop.eup %2813  ;;  %v1722_v31 = vsel %vm1720_vm5, %v1719_v26, %v2753_v22  ;;  %v1721_v32 = vsel %vm1720_vm5, %v1718_v27, %v2752_v23 }
 0xa86   : > { %v1589_v37 = vsel %vm801_vm3, %v2814_v25, 0.0 }
 0xa87   : > { %1590 = vadd.xlane.f32.xlu0 %v1589_v37 }
 0xa9d   : > { %1646 = vrot.lane.b32.xlu0 %v3436_v47, %s3059_s25 }
 0xb05   : > { %v1588_v40 = vpop.xlane.xlu0 %1587 }
 0xb06   : > { %2815 = vrcp.f32 %v1588_v40 }
 0xb10   : > { %v2816_v63 = vpop.eup %2815 }
 0xb11   : > { %v1594_v0 = vmul.f32 %v2816_v63, %v2812_v57  ;;  %v675_v57 = vand.u32 127, %v674_v36  ;;  %v2772_v63 = vld [vmem:[%s3359_s23 + $0x8] sm:$0xff]   ;;  %v2783_v36 = vld [vmem:[%s3361_s22 + $0x20] sm:$0xff]  }
 0xb13   : > { %v1596_v1 = vpack.c.bf16 %v1594_v0, %v1594_v0  ;;  %vm676_vm8 = vcmp.lt.s32.totalorder %v675_v57, 32  ;;  %v688_v0 = vld [vmem:[%s3775_s27 + $0x8] sm:$0xff] }
 0xb14   : > { %v1591_v2 = vpop.xlane.xlu0 %1590 }
 0xb15   : > { %2817 = vrcp.f32 %v1591_v2  ;;  %2581 = vmatmul.mubr.msk.bf16.vlgmr.msra.gmra.mrb[24].mxu0 %vm801_vm3, %v1596_v1  ;;  %v2773_v1 = vld [vmem:[%s3359_s23 + $0x10] sm:$0xff]  }
 0xb16   : > { %2594 = vmatprep.mubr.msk.bf16.mxu0 %vm3048_vm2, %v3047_v28  ;;  %2591 = vmatpush3.bf16.msra.mxu0 %v2769_v7  ;;  %v687_v2 = vld [vmem:[%s3775_s27] sm:$0xff] }
 0xb17   : > { %2592 = vmatprep.subr.bf16.mxu0 %v3047_v28 }
 0xb18   : > { %v1647_v3 = vpop.permute.xlu0 %1646 }
 0xb19   : > { %v1652_v4 = vsel %vm930_vm4, %v1647_v3, 0  ;;  %v2774_v3 = vld [vmem:[%s3359_s23 + $0x18] sm:$0xff]  }
 0xb1a   : > { %2585 = vmatpush3.bf16.msra.mxu1 %v1652_v4  ;;  %2593 = vmatpush3.bf16.msra.mxu0 %v2770_v12  ;;  %v2775_v4 = vld [vmem:[%s3359_s23 + $0x20] sm:$0xff]  }
 0xb1b   : > { %2598 = vmatprep.subr.bf16.mxu1 %v3047_v28  ;;  %2618 = vmatprep.subr.bf16.mxu0 %v3047_v28 }
 0xb1f   : > { %v2818_v47 = vpop.eup %2817 }
 0xb20   : > { %v1595_v5 = vmul.f32 %v2818_v47, %v2814_v25  ;;  %v2776_v47 = vld [vmem:[%s3359_s23 + $0x28] sm:$0xff]  }
 0xb22   : > { %v1597_v6 = vpack.c.bf16 %v1595_v5, %v1595_v5  ;;  %v2777_v5 = vld [vmem:[%s3359_s23 + $0x30] sm:$0xff]  }
 0xb24   : > { %2587 = vmatmul.mubr.msk.bf16.vlgmr.msra.gmra.mrb[36].mxu1 %vm801_vm3, %v1597_v6  ;;  %v2778_v6 = vld [vmem:[%s3359_s23 + $0x38] sm:$0xff]  }
 0xb25   : > { %2614 = vmatprep.mubr.msk.bf16.mxu1 %vm3048_vm2, %v3047_v28  ;;  %2599 = vmatpush3.bf16.msra.mxu1 %v2771_v56 }
 0xb26   : > { %2600 = vmatprep.subr.bf16.mxu1 %v3047_v28 }
 0xb29   : > { %2601 = vmatpush3.bf16.msra.mxu1 %v2772_v63 }
 0xb2a   : > { %2602 = vmatprep.subr.bf16.mxu1 %v3047_v28 }
 0xb2d   : > { %2603 = vmatpush3.bf16.msra.mxu1 %v2773_v1 }
 0xb2e   : > { %2604 = vmatprep.subr.bf16.mxu1 %v3047_v28 }
 0xb31   : > { %2605 = vmatpush3.bf16.msra.mxu1 %v2774_v3 }
 0xb32   : > { %2606 = vmatprep.subr.bf16.mxu1 %v3047_v28 }
 0xb35   : > { %2607 = vmatpush3.bf16.msra.mxu1 %v2775_v4  ;;  %v1991_v4 = vsub.s32 3, %v3593_v41 }
 0xb36   : > { %2608 = vmatprep.subr.bf16.mxu1 %v3047_v28 }
 0xb39   : > { %2609 = vmatpush3.bf16.msra.mxu1 %v2776_v47  ;;  %v1992_v47 = vrot.slane %v3597_v44, %v1991_v4 }
 0xb3a   : > { %2610 = vmatprep.subr.bf16.mxu1 %v3047_v28 }
 0xb3d   : > { %2611 = vmatpush3.bf16.msra.mxu1 %v2777_v5 }
 0xb3e   : > { %2612 = vmatprep.subr.bf16.mxu1 %v3047_v28 }
 0xb41   : > { %2613 = vmatpush3.bf16.msra.mxu1 %v2778_v6 }
 0xbe8   : > { %v1640_v8 = vpop.f32.mrb[24].mxu0 }
 0xbe9   : > { %v2582_v9 = vpop.f32.mrb[25].mxu0 }
 0xbea   : > { %v1643_v10 = vpop.f32.mrb[26].mxu0 }
 0xbeb   : > { %v2583_v11 = vpop.f32.mrb[27].mxu0 }
 0xbf7   : > { %v1688_v13 = vpop.f32.mrb[36].mxu1 }
 0xbf8   : > { %v2754_v14 = vpack.i.bf16 %v1688_v13, %v1640_v8  ;;  %v2588_v15 = vpop.f32.mrb[37].mxu1  ;;  %v1820_v13 = vsub.s32 1, %v3593_v41 }
 0xbf9   : > { %v1691_v16 = vpop.f32.mrb[38].mxu1 }
 0xbfa   : > { %v2589_v17 = vpop.f32.mrb[39].mxu1  ;;  %2755 = vrot.lane.b32.xlu0 %v2754_v14, %s3062_s26  ;;  %v1826_v14 = vsub.s32 2, %v3593_v41  ;;  %v1821_v15 = vrot.slane %v3597_v44, %v1820_v13 }
 0xbfc   : > { %v1827_v18 = vrot.slane %v3597_v44, %v1826_v14 }
 0xc6c   : > { %v2756_v24 = vpop.permute.xlu0 %2755 }
 0xc6d   : > { %v2758_v29 = vunpack.i.h.bf16 %v2756_v24  ;;  %v2757_v30 = vunpack.i.l.bf16 %v2756_v24 }
 0xc6f   : > { %v1725_v33 = vsel %vm1723_vm6, %v1722_v31, %v2758_v29  ;;  %v1724_v34 = vsel %vm1723_vm6, %v1721_v32, %v2757_v30  ;;  %v2779_v32 = vld [vmem:[%s3361_s22] sm:$0xff]  }
 0xc70   : > { %v1726_v35 = vpack.c.bf16 %v1725_v33, %v1724_v34  ;;  %v2780_v33 = vld [vmem:[%s3361_s22 + $0x8] sm:$0xff]   ;;  %v2781_v34 = vld [vmem:[%s3361_s22 + $0x10] sm:$0xff]  }
 0xc72   : > { %2595 = vmatmul.mubr.msk.bf16.vlgmr.msra.gmra.mrb[28].mxu0 %vm1747_vm7, %v1726_v35  ;;  %v2782_v35 = vld [vmem:[%s3361_s22 + $0x18] sm:$0xff]  }
 0xc73   : > { %2634 = vmatprep.mubr.msk.bf16.mxu0 %vm3048_vm2, %v3047_v28  ;;  %2619 = vmatpush3.bf16.msra.mxu0 %v2779_v32 }
 0xc74   : > { %2620 = vmatprep.subr.bf16.mxu0 %v3047_v28 }
 0xc77   : > { %2621 = vmatpush3.bf16.msra.mxu0 %v2780_v33  ;;  %v2110_v33 = vsub.s32 4, %v3593_v41 }
 0xc78   : > { %2622 = vmatprep.subr.bf16.mxu0 %v3047_v28 }
 0xc7b   : > { %2623 = vmatpush3.bf16.msra.mxu0 %v2781_v34  ;;  %v2116_v34 = vsub.s32 5, %v3593_v41 }
 0xc7c   : > { %2624 = vmatprep.subr.bf16.mxu0 %v3047_v28 }
 0xc7f   : > { %2625 = vmatpush3.bf16.msra.mxu0 %v2782_v35  ;;  %v2111_v35 = vrot.slane %v3597_v44, %v2110_v33 }
 0xc80   : > { %2626 = vmatprep.subr.bf16.mxu0 %v3047_v28 }
 0xc83   : > { %2627 = vmatpush3.bf16.msra.mxu0 %v2783_v36 }
 0xc84   : > { %2628 = vmatprep.subr.bf16.mxu0 %v3047_v28 }
 0xc87   : > { %2629 = vmatpush3.bf16.msra.mxu0 %v2784_v48 }
 0xc88   : > { %2630 = vmatprep.subr.bf16.mxu0 %v3047_v28 }
 0xd45   : > { %v1785_v45 = vpop.f32.mrb[28].mxu0 }
 0xd46   : > { %v1786_v46 = vadd.f32 %v1785_v45, %v1734_v42  ;;  %v2596_v49 = vpop.f32.mrb[29].mxu0  ;;  %v2786_v45 = vld [vmem:[%s3361_s22 + $0x38] sm:$0xff]  }
 0xd47   : > { %v1788_v50 = vpop.f32.mrb[30].mxu0 }
 0xd48   : > { %v1789_v51 = vadd.f32 %v1788_v50, %v1734_v42  ;;  %v2597_v52 = vpop.f32.mrb[31].mxu0  ;;  %v1792_v54 = vadd.f32 %v1786_v46, %v3422_v38  ;;  %v3605_v38 = vsel %vm676_vm8, 1.0, %v3047_v28  ;;  %v2785_v42 = vld [vmem:[%s3361_s22 + $0x30] sm:$0xff]  }
 0xd49   : > { %2631 = vmatpush3.bf16.msra.mxu0 %v2785_v42  ;;  %v2386_v46 = vld [vmem:[%s609_s28] ss:$0 sm:$0xff] }
 0xd4a   : > { %1794 = vadd.xlane.f32.xlu1 %v1792_v54  ;;  %v1793_v53 = vadd.f32 %v1789_v51, %v3424_v39  ;;  %2632 = vmatprep.subr.bf16.mxu0 %v3047_v28 }
 0xd4c   : > { %1796 = vadd.xlane.f32.xlu0 %v1793_v53 }
 0xd4d   : > { %2633 = vmatpush3.bf16.msra.mxu0 %v2786_v45 }
 0xdd7   : > { %v1795_v61 = vpop.xlane.xlu1 %1794 }
 0xdd8   : > { %v1798_v58 = vmul.f32 0.03125, %v1795_v61 }
 0xdd9   : > { %v1797_v59 = vpop.xlane.xlu0 %1796 }
 0xdda   : > { %v1800_v60 = vsub.f32 %v1792_v54, %v1798_v58  ;;  %v1799_v39 = vmul.f32 0.03125, %v1797_v59 }
 0xddc   : > { %v1801_v43 = vsub.f32 %v1793_v53, %v1799_v39  ;;  %v1802_v62 = vmul.f32 %v3605_v38, %v1800_v60 }
 0xdde   : > { %v1804_v25 = vmul.f32 %v1802_v62, %v1802_v62  ;;  %v1803_v37 = vmul.f32 %v3605_v38, %v1801_v43 }
 0xde0   : > { %1806 = vadd.xlane.f32.xlu0 %v1804_v25  ;;  %v1805_v40 = vmul.f32 %v1803_v37, %v1803_v37 }
 0xde2   : > { %1808 = vadd.xlane.f32.xlu1 %v1805_v40 }
 0xdf3   : > { %1837 = vperm.xlu1 %2760, %v688_v0  }
 0xdf6   : > { %1832 = vperm.xlu0 %2759, %v687_v2  }
 0xe6d   : > { %v1807_v7 = vpop.xlane.xlu0 %1806 }
 0xe6e   : > { %v1810_v8 = vmul.f32 0.03125, %v1807_v7 }
 0xe6f   : > { %v1809_v9 = vpop.xlane.xlu1 %1808 }
 0xe70   : > { %v1812_v10 = vadd.f32 1e-06, %v1810_v8  ;;  %v1811_v11 = vmul.f32 0.03125, %v1809_v9 }
 0xe72   : > { %2819 = vrsqrt.f32 %v1812_v10  ;;  %v1813_v12 = vadd.f32 1e-06, %v1811_v11 }
 0xe73   : > { %v3634_v26 = vpop.permute.xlu1 %1837 }
 0xe74   : > { %2821 = vrsqrt.f32 %v1813_v12 }
 0xe75   : > { %v3632_v24 = vpop.permute.xlu0 %1832 }
 0xe7c   : > { %v2820_v16 = vpop.eup %2819 }
 0xe7d   : > { %v1816_v17 = vmul.f32 %v2820_v16, %v1802_v62 }
 0xe7e   : > { %v2822_v19 = vpop.eup %2821 }
 0xe7f   : > { %v1822_v20 = vmul.f32 %v1821_v15, %v1816_v17  ;;  %v1817_v21 = vmul.f32 %v2822_v19, %v1803_v37 }
 0xe81   : > { %v1828_v22 = vadd.f32 %v1827_v18, %v1822_v20  ;;  %v1823_v23 = vmul.f32 %v1821_v15, %v1817_v21 }
 0xe83   : > { %v1829_v27 = vadd.f32 %v1827_v18, %v1823_v23  ;;  %v3637_v29 = vmul.f32 %v3632_v24, %v1828_v22 }
 0xe85   : > { %v3640_v30 = vmul.f32 %v3634_v26, %v1829_v27 }
 0xe87   : > { %v1842_v31 = vpack.c.bf16 %v3640_v30, %v3637_v29 }
 0xe89   : > { %2615 = vmatmul.mubr.bf16.vlgmr.msra.gmra.mrb[40].mxu1 %v1842_v31 }
 0xf5c   : > { %v1947_v49 = vpop.f32.mrb[40].mxu1 }
 0xf5d   : > { %v1948_v50 = vadd.f32 %v2386_v46, %v1947_v49  ;;  %v2616_v51 = vpop.f32.mrb[41].mxu1 }
 0xf5e   : > { %v1950_v52 = vpop.f32.mrb[42].mxu1 }
 0xf5f   : > { %v1956_v54 = vmul.f32 0.044715, %v1948_v50  ;;  %v1951_v53 = vadd.f32 %v2386_v46, %v1950_v52  ;;  %v2617_v55 = vpop.f32.mrb[43].mxu1  ;;  %v1954_v40 = vmul.f32 0.5, %v1948_v50 }
 0xf61   : > { %v1958_v56 = vmul.f32 %v1956_v54, %v1948_v50  ;;  %v1957_v57 = vmul.f32 0.044715, %v1951_v53  ;;  %v1955_v63 = vmul.f32 0.5, %v1951_v53 }
 0xf63   : > { %v1960_v61 = vmul.f32 %v1958_v56, %v1948_v50  ;;  %v1959_v58 = vmul.f32 %v1957_v57, %v1951_v53 }
 0xf65   : > { %v1962_v59 = vadd.f32 %v1960_v61, %v1948_v50  ;;  %v1961_v60 = vmul.f32 %v1959_v58, %v1951_v53 }
 0xf67   : > { %v1964_v28 = vmul.f32 0.7978846, %v1962_v59  ;;  %v1963_v39 = vadd.f32 %v1961_v60, %v1951_v53 }
 0xf69   : > { %2823 = vtanh.f32 %v1964_v28  ;;  %v1965_v43 = vmul.f32 0.7978846, %v1963_v39 }
 0xf6b   : > { %2825 = vtanh.f32 %v1965_v43 }
 0xf73   : > { %v2824_v62 = vpop.eup %2823 }
 0xf74   : > { %v1968_v25 = vadd.f32 1.0, %v2824_v62 }
 0xf75   : > { %v2826_v37 = vpop.eup %2825 }
 0xf76   : > { %v1969_v0 = vadd.f32 1.0, %v2826_v37  ;;  %v1970_v1 = vmul.f32 %v1968_v25, %v1954_v40 }
 0xf78   : > { %v1971_v2 = vmul.f32 %v1969_v0, %v1955_v63 }
 0xf7a   : > { %v1972_v3 = vpack.c.bf16 %v1971_v2, %v1970_v1 }
 0xf7c   : > { %2635 = vmatmul.mubr.bf16.vlgmr.msra.gmra.mrb[32].mxu0 %v1972_v3 }
0x104f   : > { %v2075_v5 = vpop.f32.mrb[32].mxu0 }
0x1050   : > { %v2076_v6 = vadd.f32 %v2075_v5, %v1992_v47  ;;  %v2636_v7 = vpop.f32.mrb[33].mxu0 }
0x1051   : > { %v2078_v8 = vpop.f32.mrb[34].mxu0 }
0x1052   : > { %v2079_v9 = vadd.f32 %v2078_v8, %v1992_v47  ;;  %v2637_v10 = vpop.f32.mrb[35].mxu0  ;;  %v2082_v11 = vadd.f32 %v2076_v6, %v3637_v29 }
0x1054   : > { %2084 = vadd.xlane.f32.xlu1 %v2082_v11  ;;  %v2083_v12 = vadd.f32 %v2079_v9, %v3640_v30 }
0x1056   : > { %2086 = vadd.xlane.f32.xlu0 %v2083_v12 }
0x10e1   : > { %v2085_v13 = vpop.xlane.xlu1 %2084 }
0x10e2   : > { %v2088_v14 = vmul.f32 0.03125, %v2085_v13 }
0x10e3   : > { %v2087_v15 = vpop.xlane.xlu0 %2086 }
0x10e4   : > { %v2090_v16 = vsub.f32 %v2082_v11, %v2088_v14  ;;  %v2089_v17 = vmul.f32 0.03125, %v2087_v15 }
0x10e6   : > { %v2091_v18 = vsub.f32 %v2083_v12, %v2089_v17  ;;  %v2092_v19 = vmul.f32 %v3605_v38, %v2090_v16 }
0x10e8   : > { %v2094_v20 = vmul.f32 %v2092_v19, %v2092_v19  ;;  %v2093_v21 = vmul.f32 %v3605_v38, %v2091_v18  ;;  %v2117_v38 = vrot.slane %v3597_v44, %v2116_v34 }
0x10ea   : > { %2096 = vadd.xlane.f32.xlu1 %v2094_v20  ;;  %v2095_v22 = vmul.f32 %v2093_v21, %v2093_v21 }
0x10ee   : > { %2098 = vadd.xlane.f32.xlu1 %v2095_v22 }
0x1177   : > { %v2097_v23 = vpop.xlane.xlu1 %2096 }
0x1178   : > { %v2100_v27 = vmul.f32 0.03125, %v2097_v23 }
0x117a   : > { %v2102_v29 = vadd.f32 1e-06, %v2100_v27 }
0x117b   : > { %v2099_v31 = vpop.xlane.xlu1 %2098 }
0x117c   : > { %2827 = vrsqrt.f32 %v2102_v29  ;;  %v2101_v30 = vmul.f32 0.03125, %v2099_v31 }
0x117e   : > { %v2103_v32 = vadd.f32 1e-06, %v2101_v30 }
0x1180   : > { %2829 = vrsqrt.f32 %v2103_v32 }
0x1186   : > { %v2828_v36 = vpop.eup %2827 }
0x1187   : > { %v2106_v48 = vmul.f32 %v2828_v36, %v2092_v19 }
0x1189   : > { %v2112_v42 = vmul.f32 %v2111_v35, %v2106_v48 }
0x118a   : > { %v2830_v45 = vpop.eup %2829 }
0x118b   : > { %v2118_v46 = vadd.f32 %v2117_v38, %v2112_v42  ;;  %v2107_v49 = vmul.f32 %v2830_v45, %v2093_v21 }
0x118d   : > { %v2120_v50 = vmul.f32 %v2118_v46, %v3632_v24  ;;  %v2113_v51 = vmul.f32 %v2111_v35, %v2107_v49  ;;  %2127 = sbr.rel (%p2403_p7) target bundleno = 4500 (0x1194), region = 88 }
0x118f   : > { %2122 = vst [vmem:[#allocation2] sm:$0xff] %v2120_v50  ;;  %v2119_v52 = vadd.f32 %v2117_v38, %v2113_v51  ;;  %2128 = vst [vmem:[#allocation12] sm:$0xff] (!%p2403_p7), %v2120_v50 }
0x1191   : > { %v2121_v54 = vmul.f32 %v2119_v52, %v3634_v26 }
0x1193   : > { %2123 = vst [vmem:[#allocation2 + $0x8] sm:$0xff] %v2121_v54  ;;  %2129 = vst [vmem:[#allocation12 + $0x8] sm:$0xff] (!%p2403_p7), %v2121_v54 }
0x1194 PF: > { %p2669_p9 = scmp.eq.s32.totalorder %s3225_s16, 1  ;;  %s3064_s22 = smov [#allocation12]  }
0x1195   : > { %s2139_s14 = sshll.u32 %s3064_s22, 4  ;;  %s2140_s14 = int_to_ptr.vmem [resolvable:$true] %s2139_s14 }
0x1196   : > { %s2949_s28 = scalar_lea.vmem %s2140_s14, 256  ;;  %p2956_p13 = scmp.lt.s32.totalorder %s2140_s14, %s2140_s14 }
0x1197   : > { %p2950_p12 = scmp.ne.s32.totalorder %s2140_s14, %s2949_s28  ;;  %p2957_p3 = scmp.lt.s32.totalorder %s2949_s28, %s2949_s28 }
0x1199   : > { %p2951_p10 = pnand %p2950_p12, %p2669_p9  ;;  %p2958_p2 = por %p2957_p3, %p2956_p13 }
0x119b   : > { %p2952_p6 = pneg %p2951_p10 }
0x119d   : > { %p2959_p8 = pnand %p2958_p2, %p2952_p6 }
0x119f   : > { %2962 = shalt.err (!%p2959_p8)
}
0x11a0   : > { %s3776_s13 = sld [smem:[#allocation25_spill]] }
0x11a6   : > { %s2963_s2 = scalar_lea.hbm %s3776_s13, 256 }
0x11a7   : > { %p2964_p5 = scmp.ne.s32.totalorder %s3776_s13, %s2963_s2  ;;  %p2969_p1 = scmp.lt.u32.totalorder %s2963_s2, %s3776_s13 }
0x11a9   : > { %p2965_p11 = pnand %p2964_p5, %p2669_p9 }
0x11ab   : > { %p2966_p0 = pneg %p2965_p11 }
0x11ad   : > { %p2971_p4 = pnand %p2969_p1, %p2966_p0 }
0x11af   : > { %2974 = shalt.err (!%p2971_p4)
}
0x11b0   : > { %s3065_s7 = smov 128  }
0x11b1   : > { %2649 = dma.vmem_to_hbm [thread:$0]  (%p2669_p9), %s2140_s14, 256, %s3776_s13, [#allocation6], %s3065_s7, %s3065_s7, %s3060_s3  }
0x11b2   : > { %3012 = dma.done.wait (%p2669_p9), [#allocation6], 256  }
0x11b3   : > { %3014 = vsyncadd (%p2669_p9), [#allocation6], 4294967040 }
0x11b4 PF: > { %s3777_s17 = sld [smem:[#allocation18_spill]]  ;;  %s3778_s24 = sld [smem:[#allocation20_spill]] }
0x11b5   : > { %s3779_s20 = sld [smem:[#allocation17_spill]]  ;;  %s3780_s21 = sld [smem:[#allocation19_spill]] }
0x11ba   : > { %s29_s22 = sadd.s32 1, %s3777_s17   ;;  %s3781_s17 = smov %s3021_s18 }
0x11bb   : > { %p26_p7 = scmp.ge.s32.totalorder %s29_s22, 4   ;;  %s3782_s18 = smov %s3025_s19 }
0x11bc   : > { %s3783_s19 = smov %s3778_s24 }
0x11bd   :  { %28 = sbr.rel (!%p26_p7) target bundleno = 14 (0xe), region = 157 }
0x11c4   :  { %2155 = vsyncpa [#allocation5], 1 }
0x11c5   :  { %2157 = vsyncpa [#allocation5 + $0x1], 1 }
0x11c6   :  { %2158 = vsyncpa [#allocation8], 1 }
0x11c7   :  { %2160 = vsyncpa [#allocation8 + $0x1], 1 }
0x11c8   :  { %2161 = vsyncpa [#allocation11], 1 }
0x11c9   :  { %2163 = vsyncpa [#allocation11 + $0x1], 1 }
0x11ca   :  { %2164 = vsyncpa [#allocation6], 1 }
0x11cb   :  { %2166 = vsyncpa [#allocation6 + $0x1], 1 }

</bundles_post_ra>
